<compile_context>
chip_gen: v5e
topology: v5e:2x2
jax: 0.10.0
libtpu: 0.0.40
codegen_flags: <defaults>
</compile_context>

<pallas_src>
import functools
import math

import jax
import jax.numpy as jnp
import numpy as np
from jax import lax
from jax.experimental import pallas as pl
from jax.experimental.pallas import tpu as pltpu

LANES = 1024
_INV_LN10 = 1.0 / math.log(10.0)
_T1 = 1.25
_T2 = 1.25 ** 2   # 1.5625
_T3 = 1.25 ** 3   # 1.953125


def _metric_kernel(pred_ref, gt_ref, acc_ref, *, block_rows, steps, valid_n,
                   need_mask):
    """Accumulate per-lane partial sums of all depth metrics.

    pred_ref, gt_ref : (block_rows, 1024) VMEM tiles of the padded depth slab
    acc_ref          : (8, 1024) VMEM output block, resident across the
                       reduction axis (grid axis 1); row k = metric k
                       (0..2 threshold counts, 3 sq err, 4 abs-rel,
                        5 sq-rel, 6 log10 err, 7 unused).
    """
    i = pl.program_id(1)

    @pl.when(i == 0)
    def _init():
        acc_ref[...] = jnp.zeros_like(acc_ref)

    p = pred_ref[...]
    g = gt_ref[...]

    diff = g - p
    sq = diff * diff
    inv_g = 1.0 / g                       # exact reciprocal (abs_rel / sq_rel)
    abs_rel_e = jnp.abs(diff) * inv_g
    sq_rel_e = sq * inv_g
    # |log10(p) - log10(g)| == |log(p/g)| / ln(10); reuse inv_g, single log.
    log_e = jnp.abs(jnp.log(p * inv_g)) * jnp.float32(_INV_LN10)

    # max(g/p, p/g) < t  <=>  (g < t*p) & (p < t*g)  for strictly positive
    # depths -- pure multiplies/compares, no divisions.
    c0 = (g < _T1 * p) & (p < _T1 * g)
    c1 = (g < _T2 * p) & (p < _T2 * g)
    c2 = (g < _T3 * p) & (p < _T3 * g)

    if need_mask:
        block_idx = pl.program_id(0) * steps + i
        base = block_idx * (block_rows * LANES)
        row = lax.broadcasted_iota(jnp.int32, (block_rows, LANES), 0)
        col = lax.broadcasted_iota(jnp.int32, (block_rows, LANES), 1)
        valid = (base + row * LANES + col) < valid_n
        m = valid.astype(jnp.float32)
        c0 &= valid
        c1 &= valid
        c2 &= valid
        sq = sq * m
        abs_rel_e = abs_rel_e * m
        sq_rel_e = sq_rel_e * m
        log_e = log_e * m

    def _acc(k, x):
        acc_ref[pl.ds(k, 1), :] += jnp.sum(x, axis=0, keepdims=True)

    _acc(0, c0.astype(jnp.float32))
    _acc(1, c1.astype(jnp.float32))
    _acc(2, c2.astype(jnp.float32))
    _acc(3, sq)
    _acc(4, abs_rel_e)
    _acc(5, sq_rel_e)
    _acc(6, log_e)


def depth_metric_sums(pred_flat, gt_flat, *, max_block_rows=256,
                      two_core_split=True):
    """pred_flat, gt_flat: 1-D float32 arrays of length n (any n >= 1).

    Returns (8,) float32 global sums:
      [#(thresh<1.25), #(thresh<1.25^2), #(thresh<1.25^3),
       sum (g-p)^2, sum |g-p|/g, sum (g-p)^2/g, sum |log10 p - log10 g|, 0]
    """
    assert pred_flat.shape == gt_flat.shape and pred_flat.ndim == 1
    assert max_block_rows % 8 == 0
    n = int(pred_flat.shape[0])

    rows = max(-(-n // LANES), 1)
    rows8 = -(-rows // 8) * 8
    block_rows = min(max_block_rows, rows8)
    num_splits = 2 if (two_core_split and rows8 >= 2 * block_rows) else 1
    chunk = num_splits * block_rows
    rows_p = -(-rows8 // chunk) * chunk
    steps = rows_p // chunk
    total = rows_p * LANES
    pad = total - n
    need_mask = pad != 0

    if pad:
        # pad with 1.0 so log / reciprocal stay finite; masked in-kernel.
        pred_flat = jnp.pad(pred_flat, (0, pad), constant_values=1.0)
        gt_flat = jnp.pad(gt_flat, (0, pad), constant_values=1.0)
    pred2d = pred_flat.reshape(rows_p, LANES)
    gt2d = gt_flat.reshape(rows_p, LANES)

    kernel = functools.partial(
        _metric_kernel, block_rows=block_rows, steps=steps, valid_n=n,
        need_mask=need_mask)

    in_spec = pl.BlockSpec((block_rows, LANES), lambda c, i: (c * steps + i, 0))

    partial_sums = pl.pallas_call(
        kernel,
        out_shape=jax.ShapeDtypeStruct((num_splits * 8, LANES), jnp.float32),
        grid_spec=pltpu.PrefetchScalarGridSpec(
            num_scalar_prefetch=0,
            grid=(num_splits, steps),
            in_specs=[in_spec, in_spec],
            out_specs=pl.BlockSpec((8, LANES), lambda c, i: (c, 0)),
        ),
        compiler_params=pltpu.CompilerParams(
            dimension_semantics=("parallel", "arbitrary")),
    )(pred2d, gt2d)

    return jnp.sum(partial_sums.reshape(num_splits, 8, LANES), axis=(0, 2))


@jax.jit
def _per_picture_metrics(pred_depth, gt_depth):
    """Single-picture metrics, fully on device; returns a (7,) f32 array:
    [rmse, log10, abs_rel, sq_rel, accu0, accu1, accu2]."""
    pred_flat = jnp.reshape(pred_depth, (-1,)).astype(jnp.float32)
    gt_flat = jnp.reshape(gt_depth, (-1,)).astype(jnp.float32)
    n = pred_flat.shape[0]
    s = depth_metric_sums(pred_flat, gt_flat)
    inv_n = jnp.float32(1.0 / n)
    rmse = jnp.sqrt(s[3] * inv_n)
    log10 = s[6] * inv_n
    abs_rel = s[4] * inv_n
    sq_rel = s[5] * inv_n
    accu0 = s[0] * inv_n
    accu1 = s[1] * inv_n
    accu2 = s[2] * inv_n
    return jnp.stack([rmse, log10, abs_rel, sq_rel, accu0, accu1, accu2])


class DepthEstmationMetric:
    """Stateful wrapper mirroring the PyTorch module semantics.

    Running-average state lives on the host (like the torch module); one
    device->host transfer of a stacked (7,) array per picture.
    """

    def __init__(self, h, w):
        self.num_pixel = h * w
        self.num_picture = 0
        self.rmse = 0.0
        self.log10 = 0.0
        self.abs_rel = 0.0
        self.sq_rel = 0.0
        self.accu0 = 0.0
        self.accu1 = 0.0
        self.accu2 = 0.0

    def __call__(self, pred_depth, gt_depth):
        self.num_picture += 1
        vals = np.asarray(_per_picture_metrics(pred_depth, gt_depth))
        self.rmse += float(vals[0])
        self.log10 += float(vals[1])
        self.abs_rel += float(vals[2])
        self.sq_rel += float(vals[3])
        self.accu0 += float(vals[4])
        self.accu1 += float(vals[5])
        self.accu2 += float(vals[6])
        k = self.num_picture
        return (self.rmse / k, self.log10 / k, self.abs_rel / k,
                self.sq_rel / k, self.accu0 / k, self.accu1 / k,
                self.accu2 / k)


# ------------------------- reference / self-test -------------------------

def _numpy_reference(pred, gt):
    """Exactly the original torch module's numpy math (single picture)."""
    pred = np.asarray(pred, dtype=np.float32).reshape(1, -1)
    gt = np.asarray(gt, dtype=np.float32).reshape(1, -1)
    thresh = np.maximum(gt / pred, pred / gt)
    accu0 = (thresh < 1.25).mean()
    accu1 = (thresh < 1.25 ** 2).mean()
    accu2 = (thresh < 1.25 ** 3).mean()
    rmse = np.sqrt(((gt - pred) ** 2).mean())
    abs_rel = np.mean(np.abs(gt - pred) / gt)
    sq_rel = np.mean((gt - pred) ** 2 / gt)
    log10 = np.mean(np.abs(np.log10(pred) - np.log10(gt)))
    return (rmse, log10, abs_rel, sq_rel, accu0, accu1, accu2)


def _numpy_reference_means(pred, gt):
    """f64 reference for the raw-sum kernel (means), threshold counts use the
    same product formulation in f32 so counts match bit-exactly."""
    p = np.asarray(pred, dtype=np.float32).reshape(-1)
    g = np.asarray(gt, dtype=np.float32).reshape(-1)
    n = float(p.size)
    c0 = np.sum((g < np.float32(_T1) * p) & (p < np.float32(_T1) * g))
    c1 = np.sum((g < np.float32(_T2) * p) & (p < np.float32(_T2) * g))
    c2 = np.sum((g < np.float32(_T3) * p) & (p < np.float32(_T3) * g))
    p64 = p.astype(np.float64)
    g64 = g.astype(np.float64)
    d = g64 - p64
    return np.array([c0 / n, c1 / n, c2 / n,
                     np.sum(d * d) / n,
                     np.sum(np.abs(d) / g64) / n,
                     np.sum(d * d / g64) / n,
                     np.sum(np.abs(np.log10(p64) - np.log10(g64))) / n])


if __name__ == "__main__":
    H, W = 16, 16  # cfg.dataset.h, cfg.dataset.w

    key = jax.random.PRNGKey(0)
    k1, k2, k3, k4 = jax.random.split(key, 4)

    metric = DepthEstmationMetric(H, W)

    # Picture 1: positive depths, NCHW-like (1, 1, H, W).
    pred1 = jax.random.uniform(k1, (1, 1, H, W), jnp.float32, 0.5, 5.0)
    gt1 = jax.random.uniform(k2, (1, 1, H, W), jnp.float32, 0.5, 5.0)
    out1 = metric(pred1, gt1)
    jax.block_until_ready(jnp.asarray(out1))
    ref1 = np.asarray(_numpy_reference(pred1, gt1))
    np.testing.assert_allclose(np.asarray(out1), ref1, rtol=1e-5, atol=1e-5)

    # Picture 2: checks the running-average (stateful) behaviour.
    pred2 = jax.random.uniform(k3, (1, 1, H, W), jnp.float32, 0.5, 5.0)
    gt2 = jax.random.uniform(k4, (1, 1, H, W), jnp.float32, 0.5, 5.0)
    out2 = metric(pred2, gt2)
    ref2 = np.asarray(_numpy_reference(pred2, gt2))
    np.testing.assert_allclose(np.asarray(out2), (ref1 + ref2) / 2.0,
                               rtol=1e-5, atol=1e-5)

    # Exercise the multi-block + 2-way split + masked-tail paths with small
    # data (40000 px -> 48 padded rows of 1024, grid (2, 3) at block_rows=8).
    kp, kg = jax.random.split(jax.random.PRNGKey(1))
    n_big = 40 * 1000
    p_big = jax.random.uniform(kp, (n_big,), jnp.float32, 0.5, 5.0)
    g_big = jax.random.uniform(kg, (n_big,), jnp.float32, 0.5, 5.0)
    sums = jax.block_until_ready(
        depth_metric_sums(p_big, g_big, max_block_rows=8, two_core_split=True))
    means = np.asarray(sums[:7]) / float(n_big)
    np.testing.assert_allclose(means, _numpy_reference_means(p_big, g_big),
                               rtol=2e-5, atol=1e-5)

    print("KERNEL_OK")
</pallas_src>

<mosaic_0001>
module attributes {stable_mosaic.version = 11 : i64} {
  func.func @_metric_kernel(%arg0: i32, %arg1: i32, %arg2: memref<8x1024xf32, #tpu.memory_space<vmem>>, %arg3: memref<8x1024xf32, #tpu.memory_space<vmem>>, %arg4: memref<8x1024xf32, #tpu.memory_space<vmem>>) attributes {dimension_semantics = [#tpu.dimension_semantics<parallel>, #tpu.dimension_semantics<arbitrary>], iteration_bounds = array<i64: 1, 1>, scalar_prefetch = 0 : i64, scratch_operands = 0 : i64, tpu.core_type = #tpu.core_type<tc>, window_params = [{transform_indices = @transform_0, window_bounds = array<i64: 8, 1024>}, {transform_indices = @transform_1, window_bounds = array<i64: 8, 1024>}, {transform_indices = @transform_2, window_bounds = array<i64: 8, 1024>}]} {
    %c0_i32 = arith.constant 0 : i32
    %0 = arith.cmpi eq, %arg1, %c0_i32 : i32
    %1 = arith.extui %0 : i1 to i32
    %c0_i32_0 = arith.constant 0 : i32
    %2 = arith.cmpi ne, %1, %c0_i32_0 : i32
    scf.if %2 {
      %cst_40 = arith.constant 0.000000e+00 : f32
      %100 = vector.broadcast %cst_40 : f32 to vector<8x1024xf32>
      %c0_41 = arith.constant 0 : index
      %c0_42 = arith.constant 0 : index
      %101 = vector.load %arg4[%c0_41, %c0_42] : memref<8x1024xf32, #tpu.memory_space<vmem>>, vector<8x1024xf32>
      tpu.vector_store %arg4[%c0_41, %c0_42], %100 {strides = array<i32>} : memref<8x1024xf32, #tpu.memory_space<vmem>>, vector<8x1024xf32>,
    } else {
    }
    %c0 = arith.constant 0 : index
    %c0_1 = arith.constant 0 : index
    %3 = vector.load %arg2[%c0, %c0_1] : memref<8x1024xf32, #tpu.memory_space<vmem>>, vector<8x1024xf32>
    %c0_2 = arith.constant 0 : index
    %c0_3 = arith.constant 0 : index
    %4 = vector.load %arg3[%c0_2, %c0_3] : memref<8x1024xf32, #tpu.memory_space<vmem>>, vector<8x1024xf32>
    %5 = arith.subf %4, %3 : vector<8x1024xf32>
    %6 = arith.mulf %5, %5 : vector<8x1024xf32>
    %cst = arith.constant 1.000000e+00 : f32
    %7 = vector.broadcast %cst : f32 to vector<8x1024xf32>
    %8 = arith.divf %7, %4 : vector<8x1024xf32>
    %9 = math.absf %5 : vector<8x1024xf32>
    %10 = arith.mulf %9, %8 : vector<8x1024xf32>
    %11 = arith.mulf %6, %8 : vector<8x1024xf32>
    %12 = arith.mulf %3, %8 : vector<8x1024xf32>
    %13 = math.log %12 : vector<8x1024xf32>
    %14 = math.absf %13 : vector<8x1024xf32>
    %cst_4 = arith.constant 0.434294492 : f32
    %15 = vector.broadcast %cst_4 : f32 to vector<8x1024xf32>
    %16 = arith.mulf %14, %15 : vector<8x1024xf32>
    %cst_5 = arith.constant 1.250000e+00 : f32
    %17 = vector.broadcast %cst_5 : f32 to vector<8x1024xf32>
    %18 = arith.mulf %17, %3 : vector<8x1024xf32>
    %19 = arith.cmpf olt, %4, %18 : vector<8x1024xf32>
    %cst_6 = arith.constant 1.250000e+00 : f32
    %20 = vector.broadcast %cst_6 : f32 to vector<8x1024xf32>
    %21 = arith.mulf %20, %4 : vector<8x1024xf32>
    %22 = arith.cmpf olt, %3, %21 : vector<8x1024xf32>
    %23 = arith.andi %19, %22 : vector<8x1024xi1>
    %cst_7 = arith.constant 1.562500e+00 : f32
    %24 = vector.broadcast %cst_7 : f32 to vector<8x1024xf32>
    %25 = arith.mulf %24, %3 : vector<8x1024xf32>
    %26 = arith.cmpf olt, %4, %25 : vector<8x1024xf32>
    %cst_8 = arith.constant 1.562500e+00 : f32
    %27 = vector.broadcast %cst_8 : f32 to vector<8x1024xf32>
    %28 = arith.mulf %27, %4 : vector<8x1024xf32>
    %29 = arith.cmpf olt, %3, %28 : vector<8x1024xf32>
    %30 = arith.andi %26, %29 : vector<8x1024xi1>
    %cst_9 = arith.constant 1.953125 : f32
    %31 = vector.broadcast %cst_9 : f32 to vector<8x1024xf32>
    %32 = arith.mulf %31, %3 : vector<8x1024xf32>
    %33 = arith.cmpf olt, %4, %32 : vector<8x1024xf32>
    %cst_10 = arith.constant 1.953125 : f32
    %34 = vector.broadcast %cst_10 : f32 to vector<8x1024xf32>
    %35 = arith.mulf %34, %4 : vector<8x1024xf32>
    %36 = arith.cmpf olt, %3, %35 : vector<8x1024xf32>
    %37 = arith.andi %33, %36 : vector<8x1024xi1>
    %c1_i32 = arith.constant 1 : i32
    %38 = arith.muli %arg0, %c1_i32 : i32
    %39 = arith.addi %38, %arg1 : i32
    %c8192_i32 = arith.constant 8192 : i32
    %40 = arith.muli %39, %c8192_i32 : i32
    %41 = tpu.iota {dimensions = array<i32: 0>} : vector<8x1024xi32>
    %42 = tpu.iota {dimensions = array<i32: 1>} : vector<8x1024xi32>
    %c1024_i32 = arith.constant 1024 : i32
    %43 = vector.broadcast %c1024_i32 : i32 to vector<8x1024xi32>
    %44 = arith.muli %41, %43 : vector<8x1024xi32>
    %45 = vector.broadcast %40 : i32 to vector<8x1024xi32>
    %46 = arith.addi %45, %44 : vector<8x1024xi32>
    %47 = arith.addi %46, %42 : vector<8x1024xi32>
    %c256_i32 = arith.constant 256 : i32
    %48 = vector.broadcast %c256_i32 : i32 to vector<8x1024xi32>
    %49 = arith.cmpi slt, %47, %48 : vector<8x1024xi32>
    %50 = arith.extui %49 : vector<8x1024xi1> to vector<8x1024xi32>
    %51 = arith.sitofp %50 : vector<8x1024xi32> to vector<8x1024xf32>
    %52 = arith.andi %23, %49 : vector<8x1024xi1>
    %53 = arith.andi %30, %49 : vector<8x1024xi1>
    %54 = arith.andi %37, %49 : vector<8x1024xi1>
    %55 = arith.mulf %6, %51 : vector<8x1024xf32>
    %56 = arith.mulf %10, %51 : vector<8x1024xf32>
    %57 = arith.mulf %11, %51 : vector<8x1024xf32>
    %58 = arith.mulf %16, %51 : vector<8x1024xf32>
    %59 = arith.extui %52 : vector<8x1024xi1> to vector<8x1024xi32>
    %60 = arith.sitofp %59 : vector<8x1024xi32> to vector<8x1024xf32>
    %c0_11 = arith.constant 0 : index
    %c0_12 = arith.constant 0 : index
    %61 = vector.load %arg4[%c0_11, %c0_12] : memref<8x1024xf32, #tpu.memory_space<vmem>>, vector<1x1024xf32>
    %cst_13 = arith.constant dense<0.000000e+00> : vector<1024xf32>
    %62 = vector.multi_reduction <add>, %60, %cst_13 [0] : vector<8x1024xf32> to vector<1024xf32>
    %63 = vector.shape_cast %62 : vector<1024xf32> to vector<1x1024xf32>
    %64 = arith.addf %61, %63 : vector<1x1024xf32>
    %c0_14 = arith.constant 0 : index
    %c0_15 = arith.constant 0 : index
    %65 = vector.load %arg4[%c0_14, %c0_15] : memref<8x1024xf32, #tpu.memory_space<vmem>>, vector<1x1024xf32>
    tpu.vector_store %arg4[%c0_14, %c0_15], %64 {strides = array<i32>} : memref<8x1024xf32, #tpu.memory_space<vmem>>, vector<1x1024xf32>,
    %66 = arith.extui %53 : vector<8x1024xi1> to vector<8x1024xi32>
    %67 = arith.sitofp %66 : vector<8x1024xi32> to vector<8x1024xf32>
    %c1 = arith.constant 1 : index
    %c0_16 = arith.constant 0 : index
    %68 = vector.load %arg4[%c1, %c0_16] : memref<8x1024xf32, #tpu.memory_space<vmem>>, vector<1x1024xf32>
    %cst_17 = arith.constant dense<0.000000e+00> : vector<1024xf32>
    %69 = vector.multi_reduction <add>, %67, %cst_17 [0] : vector<8x1024xf32> to vector<1024xf32>
    %70 = vector.shape_cast %69 : vector<1024xf32> to vector<1x1024xf32>
    %71 = arith.addf %68, %70 : vector<1x1024xf32>
    %c1_18 = arith.constant 1 : index
    %c0_19 = arith.constant 0 : index
    %72 = vector.load %arg4[%c1_18, %c0_19] : memref<8x1024xf32, #tpu.memory_space<vmem>>, vector<1x1024xf32>
    tpu.vector_store %arg4[%c1_18, %c0_19], %71 {strides = array<i32>} : memref<8x1024xf32, #tpu.memory_space<vmem>>, vector<1x1024xf32>,
    %73 = arith.extui %54 : vector<8x1024xi1> to vector<8x1024xi32>
    %74 = arith.sitofp %73 : vector<8x1024xi32> to vector<8x1024xf32>
    %c2 = arith.constant 2 : index
    %c0_20 = arith.constant 0 : index
    %75 = vector.load %arg4[%c2, %c0_20] : memref<8x1024xf32, #tpu.memory_space<vmem>>, vector<1x1024xf32>
    %cst_21 = arith.constant dense<0.000000e+00> : vector<1024xf32>
    %76 = vector.multi_reduction <add>, %74, %cst_21 [0] : vector<8x1024xf32> to vector<1024xf32>
    %77 = vector.shape_cast %76 : vector<1024xf32> to vector<1x1024xf32>
    %78 = arith.addf %75, %77 : vector<1x1024xf32>
    %c2_22 = arith.constant 2 : index
    %c0_23 = arith.constant 0 : index
    %79 = vector.load %arg4[%c2_22, %c0_23] : memref<8x1024xf32, #tpu.memory_space<vmem>>, vector<1x1024xf32>
    tpu.vector_store %arg4[%c2_22, %c0_23], %78 {strides = array<i32>} : memref<8x1024xf32, #tpu.memory_space<vmem>>, vector<1x1024xf32>,
    %c3 = arith.constant 3 : index
    %c0_24 = arith.constant 0 : index
    %80 = vector.load %arg4[%c3, %c0_24] : memref<8x1024xf32, #tpu.memory_space<vmem>>, vector<1x1024xf32>
    %cst_25 = arith.constant dense<0.000000e+00> : vector<1024xf32>
    %81 = vector.multi_reduction <add>, %55, %cst_25 [0] : vector<8x1024xf32> to vector<1024xf32>
    %82 = vector.shape_cast %81 : vector<1024xf32> to vector<1x1024xf32>
    %83 = arith.addf %80, %82 : vector<1x1024xf32>
    %c3_26 = arith.constant 3 : index
    %c0_27 = arith.constant 0 : index
    %84 = vector.load %arg4[%c3_26, %c0_27] : memref<8x1024xf32, #tpu.memory_space<vmem>>, vector<1x1024xf32>
    tpu.vector_store %arg4[%c3_26, %c0_27], %83 {strides = array<i32>} : memref<8x1024xf32, #tpu.memory_space<vmem>>, vector<1x1024xf32>,
    %c4 = arith.constant 4 : index
    %c0_28 = arith.constant 0 : index
    %85 = vector.load %arg4[%c4, %c0_28] : memref<8x1024xf32, #tpu.memory_space<vmem>>, vector<1x1024xf32>
    %cst_29 = arith.constant dense<0.000000e+00> : vector<1024xf32>
    %86 = vector.multi_reduction <add>, %56, %cst_29 [0] : vector<8x1024xf32> to vector<1024xf32>
    %87 = vector.shape_cast %86 : vector<1024xf32> to vector<1x1024xf32>
    %88 = arith.addf %85, %87 : vector<1x1024xf32>
    %c4_30 = arith.constant 4 : index
    %c0_31 = arith.constant 0 : index
    %89 = vector.load %arg4[%c4_30, %c0_31] : memref<8x1024xf32, #tpu.memory_space<vmem>>, vector<1x1024xf32>
    tpu.vector_store %arg4[%c4_30, %c0_31], %88 {strides = array<i32>} : memref<8x1024xf32, #tpu.memory_space<vmem>>, vector<1x1024xf32>,
    %c5 = arith.constant 5 : index
    %c0_32 = arith.constant 0 : index
    %90 = vector.load %arg4[%c5, %c0_32] : memref<8x1024xf32, #tpu.memory_space<vmem>>, vector<1x1024xf32>
    %cst_33 = arith.constant dense<0.000000e+00> : vector<1024xf32>
    %91 = vector.multi_reduction <add>, %57, %cst_33 [0] : vector<8x1024xf32> to vector<1024xf32>
    %92 = vector.shape_cast %91 : vector<1024xf32> to vector<1x1024xf32>
    %93 = arith.addf %90, %92 : vector<1x1024xf32>
    %c5_34 = arith.constant 5 : index
    %c0_35 = arith.constant 0 : index
    %94 = vector.load %arg4[%c5_34, %c0_35] : memref<8x1024xf32, #tpu.memory_space<vmem>>, vector<1x1024xf32>
    tpu.vector_store %arg4[%c5_34, %c0_35], %93 {strides = array<i32>} : memref<8x1024xf32, #tpu.memory_space<vmem>>, vector<1x1024xf32>,
    %c6 = arith.constant 6 : index
    %c0_36 = arith.constant 0 : index
    %95 = vector.load %arg4[%c6, %c0_36] : memref<8x1024xf32, #tpu.memory_space<vmem>>, vector<1x1024xf32>
    %cst_37 = arith.constant dense<0.000000e+00> : vector<1024xf32>
    %96 = vector.multi_reduction <add>, %58, %cst_37 [0] : vector<8x1024xf32> to vector<1024xf32>
    %97 = vector.shape_cast %96 : vector<1024xf32> to vector<1x1024xf32>
    %98 = arith.addf %95, %97 : vector<1x1024xf32>
    %c6_38 = arith.constant 6 : index
    %c0_39 = arith.constant 0 : index
    %99 = vector.load %arg4[%c6_38, %c0_39] : memref<8x1024xf32, #tpu.memory_space<vmem>>, vector<1x1024xf32>
    tpu.vector_store %arg4[%c6_38, %c0_39], %98 {strides = array<i32>} : memref<8x1024xf32, #tpu.memory_space<vmem>>, vector<1x1024xf32>,
    return
  }
  func.func @transform_0(%arg0: i32, %arg1: i32) -> (i32, i32) {
    %c1_i32 = arith.constant 1 : i32
    %0 = arith.muli %arg0, %c1_i32 : i32
    %1 = arith.addi %0, %arg1 : i32
    %c0_i32 = arith.constant 0 : i32
    %c0_i32_0 = arith.constant 0 : i32
    return %1, %c0_i32 : i32, i32
  }
  func.func @transform_1(%arg0: i32, %arg1: i32) -> (i32, i32) {
    %c1_i32 = arith.constant 1 : i32
    %0 = arith.muli %arg0, %c1_i32 : i32
    %1 = arith.addi %0, %arg1 : i32
    %c0_i32 = arith.constant 0 : i32
    %c0_i32_0 = arith.constant 0 : i32
    return %1, %c0_i32 : i32, i32
  }
  func.func @transform_2(%arg0: i32, %arg1: i32) -> (i32, i32) {
    %c0_i32 = arith.constant 0 : i32
    %c0_i32_0 = arith.constant 0 : i32
    return %arg0, %c0_i32 : i32, i32
  }
}

</mosaic_0001>

<bundles_post_ra>
// kernel: _per_picture_metrics.1
= control target key start
LH: loop header
LB: loop body
LE: loop exit
PB: predicated region body
PF: predicated region fallthrough
CT: control target
= control target key end

     0   :  { %v1224_v0 = vmov 0.0   ;;  %v401_v17 = vlaneseq  ;;  %s2379_s2 = inlined_call_operand.vmem [shape: f32[8,1024], index: 2, kind: output, shape index: {}]   ;;  %s2380_s0 = inlined_call_operand.vmem [shape: f32[8,1024], index: 0, kind: input, shape index: {}]   ;;  %s2381_s1 = inlined_call_operand.vmem [shape: f32[8,1024], index: 1, kind: input, shape index: {}]  }
   0x1   :  { %55 = vst [vmem:[%s2379_s2] sm:$0xff] %v1224_v0  ;;  %v1247_v1 = vld [vmem:[%s2380_s0] sm:$0xff]  ;;  %v1256_v2 = vld [vmem:[%s2380_s0 + $0x8] sm:$0xff]  ;;  %v1261_v3 = vld [vmem:[%s2380_s0 + $0x10] sm:$0xff] }
   0x2   :  { %56 = vst [vmem:[%s2379_s2 + $0x8] sm:$0xff] %v1224_v0  ;;  %v279_v4 = vmul.f32 1.25, %v1247_v1  ;;  %v1271_v5 = vld [vmem:[%s2380_s0 + $0x18] sm:$0xff]  ;;  %v1276_v6 = vld [vmem:[%s2380_s0 + $0x20] sm:$0xff]  ;;  %v1281_v7 = vld [vmem:[%s2380_s0 + $0x28] sm:$0xff]  ;;  %v280_v11 = vmul.f32 1.25, %v1256_v2 }
   0x3   :  { %57 = vst [vmem:[%s2379_s2 + $0x10] sm:$0xff] %v1224_v0  ;;  %v1290_v8 = vld [vmem:[%s2380_s0 + $0x30] sm:$0xff]  ;;  %v1295_v9 = vld [vmem:[%s2380_s0 + $0x38] sm:$0xff]  ;;  %v1300_v10 = vld [vmem:[%s2381_s1] sm:$0xff]  ;;  %v281_v15 = vmul.f32 1.25, %v1261_v3  ;;  %v282_v16 = vmul.f32 1.25, %v1271_v5 }
   0x4   :  { %58 = vst [vmem:[%s2379_s2 + $0x18] sm:$0xff] %v1224_v0  ;;  %v1310_v12 = vld [vmem:[%s2381_s1 + $0x8] sm:$0xff]  ;;  %v1315_v13 = vld [vmem:[%s2381_s1 + $0x10] sm:$0xff]  ;;  %v1320_v14 = vld [vmem:[%s2381_s1 + $0x18] sm:$0xff]  ;;  %v283_v20 = vmul.f32 1.25, %v1276_v6  ;;  %v284_v21 = vmul.f32 1.25, %v1281_v7  ;;  %vm287_vm0 = vcmp.lt.f32.partialorder %v1300_v10, %v279_v4  ;;  %1176 = vrcp.f32 %v1300_v10 }
   0x5   :  { %59 = vst [vmem:[%s2379_s2 + $0x20] sm:$0xff] %v1224_v0  ;;  %v1331_v18 = vld [vmem:[%s2381_s1 + $0x20] sm:$0xff]  ;;  %v1336_v19 = vld [vmem:[%s2381_s1 + $0x28] sm:$0xff]  ;;  %v295_v22 = vmul.f32 1.25, %v1300_v10  ;;  %v1349_v23 = vld [vmem:[%s2381_s1 + $0x30] sm:$0xff]  ;;  %v285_v24 = vmul.f32 1.25, %v1290_v8  ;;  %vm288_vm1 = vcmp.lt.f32.partialorder %v1310_v12, %v280_v11  ;;  %vm289_vm2 = vcmp.lt.f32.partialorder %v1315_v13, %v281_v15 }
   0x6   :  { %60 = vst [vmem:[%s2379_s2 + $0x28] sm:$0xff] %v1224_v0  ;;  %v286_v25 = vmul.f32 1.25, %v1295_v9  ;;  %v296_v26 = vmul.f32 1.25, %v1310_v12  ;;  %v297_v27 = vmul.f32 1.25, %v1315_v13  ;;  %v298_v28 = vmul.f32 1.25, %v1320_v14  ;;  %v1370_v32 = vld [vmem:[%s2381_s1 + $0x38] sm:$0xff] }
   0x7   :  { %61 = vst [vmem:[%s2379_s2 + $0x30] sm:$0xff] %v1224_v0  ;;  %v299_v29 = vmul.f32 1.25, %v1331_v18  ;;  %v300_v30 = vmul.f32 1.25, %v1336_v19  ;;  %v301_v31 = vmul.f32 1.25, %v1349_v23  ;;  %vm303_vm3 = vcmp.lt.f32.partialorder %v1247_v1, %v295_v22 }
   0x8   :  { %62 = vst [vmem:[%s2379_s2 + $0x38] sm:$0xff] %v1224_v0  ;;  %vm304_vm4 = vcmp.lt.f32.partialorder %v1256_v2, %v296_v26  ;;  %vm290_vm5 = vcmp.lt.f32.partialorder %v1320_v14, %v282_v16  ;;  %vm291_vm6 = vcmp.lt.f32.partialorder %v1331_v18, %v283_v20  ;;  %vm292_vm7 = vcmp.lt.f32.partialorder %v1336_v19, %v284_v21  ;;  %vm1380_vm10 = vmand %vm287_vm0, %vm303_vm3 }
   0x9   :  { %vm305_vm8 = vcmp.lt.f32.partialorder %v1261_v3, %v297_v27  ;;  %v302_v33 = vmul.f32 1.25, %v1370_v32  ;;  %vm306_vm9 = vcmp.lt.f32.partialorder %v1271_v5, %v298_v28  ;;  %v402_v35 = vshrl.u32 %v401_v17, 7  ;;  %vm1392_vm15 = vmand %vm288_vm1, %vm304_vm4 }
   0xa   :  { %v404_v36 = vand.u32 127, %v401_v17  ;;  %vm293_vm11 = vcmp.lt.f32.partialorder %v1349_v23, %v285_v24  ;;  %vm307_vm12 = vcmp.lt.f32.partialorder %v1276_v6, %v299_v29  ;;  %vm308_vm13 = vcmp.lt.f32.partialorder %v1281_v7, %v300_v30  ;;  %vm1398_vm0 = vmand %vm289_vm2, %vm305_vm8 }
   0xb   :  { %vm309_vm14 = vcmp.lt.f32.partialorder %v1290_v8, %v301_v31  ;;  %vm1404_vm3 = vmand %vm290_vm5, %vm306_vm9  ;;  %v412_v47 = vmul.u32 1024, %v402_v35  ;;  %vm294_vm1 = vcmp.lt.f32.partialorder %v1370_v32, %v286_v25  ;;  %vm310_vm2 = vcmp.lt.f32.partialorder %v1295_v9, %v302_v33  ;;  %v1453_v59 = vld [vmem:[%s2379_s2] ss:$8 sm:$0xf] }
   0xc   :  { %v405_v39 = vadd.s32 128, %v404_v36  ;;  %v406_v40 = vadd.s32 256, %v404_v36  ;;  %v407_v41 = vadd.s32 384, %v404_v36  ;;  %v408_v42 = vadd.s32 512, %v404_v36  ;;  %vm1414_vm4 = vmand %vm291_vm6, %vm307_vm12 }
   0xd   :  { %v409_v44 = vadd.s32 640, %v404_v36  ;;  %v410_v45 = vadd.s32 768, %v404_v36  ;;  %v411_v46 = vadd.s32 896, %v404_v36  ;;  %vm1422_vm5 = vmand %vm292_vm7, %vm308_vm13  ;;  %v1426_v50 = vadd.s32 %v412_v47, %v404_v36 }
   0xe   :  { %v1428_v51 = vadd.s32 %v412_v47, %v405_v39  ;;  %v1430_v52 = vadd.s32 %v412_v47, %v406_v40  ;;  %v1432_v53 = vadd.s32 %v412_v47, %v407_v41  ;;  %vm1438_vm6 = vmand %vm293_vm11, %vm309_vm14  ;;  %v1442_v55 = vadd.s32 %v412_v47, %v408_v42 }
   0xf   :  { %v1444_v56 = vadd.s32 %v412_v47, %v409_v44  ;;  %v1446_v57 = vadd.s32 %v412_v47, %v410_v45  ;;  %v1448_v58 = vadd.s32 %v412_v47, %v411_v46  ;;  %vm1455_vm7 = vmand %vm294_vm1, %vm310_vm2  ;;  %vm2382_vm8 = vcmp.lt.s32.totalorder %v1426_v50, 256  ;;  %v1465_v61 = vld [vmem:[%s2379_s2] ss:$8 sm:$0xf0] }
  0x10   :  { %vm2393_vm9 = vcmp.lt.s32.totalorder %v1428_v51, 256  ;;  %vm447_vm13 = vmand %vm1380_vm10, %vm2382_vm8  ;;  %v1473_v62 = vmul.f32 1.5625, %v1247_v1  ;;  %vm2390_vm14 = vcmp.lt.s32.totalorder %v1442_v55, 256  ;;  %vm2413_vm10 = vcmp.lt.s32.totalorder %v1430_v52, 256 }
  0x11   :  { %vm2389_vm1 = vcmp.lt.s32.totalorder %v1444_v56, 256  ;;  %vm448_vm11 = vmand %vm1392_vm15, %vm2393_vm9  ;;  %v1127_v63 = vsel %vm447_vm13, 1.0, %v1224_v0  ;;  %vm2387_vm12 = vcmp.lt.s32.totalorder %v1448_v58, 256  ;;  %v521_v11 = vor.u32 %v1465_v61, %v1453_v59 }
  0x12   :  { %vm449_vm8 = vmand %vm1398_vm0, %vm2413_vm10  ;;  %v1128_v4 = vsel %vm448_vm11, 1.0, %v1224_v0  ;;  %v522_v15 = vrot.slane %v1127_v63, 4  ;;  %vm2414_vm2 = vcmp.lt.s32.totalorder %v1432_v53, 256  ;;  %v1497_v20 = vmul.f32 1.5625, %v1256_v2 }
  0x13   :  { %vm450_vm15 = vmand %vm1404_vm3, %vm2414_vm2  ;;  %v1129_v16 = vsel %vm449_vm8, 1.0, %v1224_v0  ;;  %v528_v17 = vrot.slane %v1128_v4, 4  ;;  %v1500_v21 = vmul.f32 1.5625, %v1261_v3  ;;  %v1508_v26 = vmul.f32 1.5625, %v1271_v5 }
  0x14   :  { %vm451_vm0 = vmand %vm1414_vm4, %vm2390_vm14  ;;  %v1130_v22 = vsel %vm450_vm15, 1.0, %v1224_v0  ;;  %v523_v24 = vadd.f32 %v1127_v63, %v522_v15  ;;  %v534_v25 = vrot.slane %v1129_v16, 4  ;;  %v1516_v30 = vmul.f32 1.5625, %v1276_v6 }
  0x15   :  { %vm452_vm3 = vmand %vm1422_vm5, %vm2389_vm1  ;;  %v1131_v27 = vsel %vm451_vm0, 1.0, %v1224_v0  ;;  %v529_v28 = vadd.f32 %v1128_v4, %v528_v17  ;;  %v540_v29 = vrot.slane %v1130_v22, 4  ;;  %vm2415_vm4 = vcmp.lt.s32.totalorder %v1446_v57, 256 }
  0x16   :  { %vm453_vm8 = vmand %vm1438_vm6, %vm2415_vm4  ;;  %v1132_v31 = vsel %vm452_vm3, 1.0, %v1224_v0  ;;  %v524_v33 = vrot.slane %v523_v24, 2  ;;  %v535_v34 = vadd.f32 %v1129_v16, %v534_v25  ;;  %v546_v35 = vrot.slane %v1131_v27, 4 }
  0x17   :  { %vm2386_vm11 = vcmask 1040384   ;;  %vm454_vm5 = vmand %vm1455_vm7, %vm2387_vm12  ;;  %v1133_v36 = vsel %vm453_vm8, 1.0, %v1224_v0  ;;  %v530_v37 = vrot.slane %v529_v28, 2  ;;  %v541_v38 = vadd.f32 %v1130_v22, %v540_v29 }
  0x18   :  { %v552_v39 = vrot.slane %v1132_v31, 4  ;;  %v1134_v40 = vsel %vm454_vm5, 1.0, %v1224_v0  ;;  %v525_v41 = vadd.f32 %v524_v33, %v523_v24  ;;  %v536_v42 = vrot.slane %v535_v34, 2 }
  0x19   :  { %v547_v43 = vadd.f32 %v1131_v27, %v546_v35  ;;  %vm2385_vm6 = vcmask 1042434   ;;  %v531_v44 = vadd.f32 %v530_v37, %v529_v28  ;;  %v542_v45 = vrot.slane %v541_v38, 2 }
  0x1a   :  { %v553_v46 = vadd.f32 %v1132_v31, %v552_v39  ;;  %v558_v47 = vrot.slane %v1133_v36, 4  ;;  %vm2384_vm13 = vcmask 1041408   ;;  %v526_v48 = vrot.slane %v525_v41, 1 }
  0x1b   :  { %v537_v49 = vadd.f32 %v536_v42, %v535_v34  ;;  %v548_v54 = vrot.slane %v547_v43, 2  ;;  %v564_v60 = vrot.slane %v1134_v40, 4  ;;  %vm2383_vm7 = vcmask 1044484  }
  0x1c   :  { %v532_v63 = vrot.slane %v531_v44, 1  ;;  %v543_v4 = vadd.f32 %v542_v45, %v541_v38  ;;  %v554_v15 = vrot.slane %v553_v46, 2  ;;  %v559_v16 = vadd.f32 %v1133_v36, %v558_v47 }
  0x1d   :  { %v527_v17 = vadd.f32 %v526_v48, %v525_v41  ;;  %v538_v22 = vrot.slane %v537_v49, 1  ;;  %v549_v24 = vadd.f32 %v548_v54, %v547_v43  ;;  %v565_v25 = vadd.f32 %v1134_v40, %v564_v60 }
  0x1e   :  { %v533_v27 = vadd.f32 %v532_v63, %v531_v44  ;;  %v544_v29 = vrot.slane %v543_v4, 1  ;;  %v555_v28 = vadd.f32 %v554_v15, %v553_v46  ;;  %v560_v33 = vrot.slane %v559_v16, 2 }
  0x1f   :  { %vm2388_vm2 = vcmask 1046534   ;;  %v539_v31 = vadd.f32 %v538_v22, %v537_v49  ;;  %v550_v35 = vrot.slane %v549_v24, 1  ;;  %v566_v37 = vrot.slane %v565_v25, 2 }
  0x20   :  { %vm2391_vm10 = vcmask 1045508   ;;  %v1530_v34 = vmul.f32 1.5625, %v1281_v7  ;;  %v545_v39 = vadd.f32 %v544_v29, %v543_v4  ;;  %v556_v38 = vrot.slane %v555_v28, 1 }
  0x21   :  { %v561_v42 = vadd.f32 %v560_v33, %v559_v16  ;;  %v578_v36 = vrot.slane %v533_v27, 7  ;;  %vm2392_vm15 = vcmask 1043456   ;;  %v551_v41 = vadd.f32 %v550_v35, %v549_v24 }
  0x22   :  { %v567_v43 = vadd.f32 %v566_v37, %v565_v25  ;;  %v579_v40 = vrot.slane %v539_v31, 6  ;;  %v325_v44 = vmul.f32 1.5625, %v1290_v8  ;;  %v557_v45 = vadd.f32 %v556_v38, %v555_v28 }
  0x23   :  { %v562_v46 = vrot.slane %v561_v42, 1  ;;  %v580_v47 = vrot.slane %v545_v39, 5  ;;  %v586_v48 = vsel %vm2386_vm11, %v527_v17, %v578_v36  ;;  %v581_v54 = vrot.slane %v551_v41, 4 }
  0x24   :  { %v568_v49 = vrot.slane %v567_v43, 1  ;;  %v326_v60 = vmul.f32 1.5625, %v1295_v9  ;;  %vm327_vm0 = vcmp.lt.f32.partialorder %v1300_v10, %v1473_v62  ;;  %v582_v4 = vrot.slane %v557_v45, 3  ;;  %v1582_v62 = vld [vmem:[%s2379_s2 + $0x1] ss:$8 sm:$0xf] }
  0x25   :  { %v563_v63 = vadd.f32 %v562_v46, %v561_v42  ;;  %v588_v15 = vsel %vm2385_vm6, %v579_v40, %v580_v47  ;;  %vm328_vm3 = vcmp.lt.f32.partialorder %v1310_v12, %v1497_v20  ;;  %vm329_vm4 = vcmp.lt.f32.partialorder %v1315_v13, %v1500_v21  ;;  %2420 = vst [vmem:[#allocation2_spill] sm:$0xff] %v1582_v62  ;;  %v1597_v40 = vld [vmem:[%s2379_s2 + $0x1] ss:$8 sm:$0xf0] }
  0x26   :  { %v569_v16 = vadd.f32 %v568_v49, %v567_v43  ;;  %v590_v22 = vsel %vm2384_vm13, %v586_v48, %v588_v15  ;;  %vm330_vm8 = vcmp.lt.f32.partialorder %v1320_v14, %v1508_v26  ;;  %v592_v24 = vsel %vm2383_vm7, %v581_v54, %v582_v4 }
  0x27   :  { %v583_v17 = vrot.slane %v563_v63, 2  ;;  %v335_v25 = vmul.f32 1.5625, %v1300_v10  ;;  %v336_v27 = vmul.f32 1.5625, %v1310_v12  ;;  %v337_v28 = vmul.f32 1.5625, %v1315_v13 }
  0x28   :  { %v584_v29 = vrot.slane %v569_v16, 1  ;;  %v338_v33 = vmul.f32 1.5625, %v1320_v14  ;;  %v339_v31 = vmul.f32 1.5625, %v1331_v18  ;;  %v340_v35 = vmul.f32 1.5625, %v1336_v19 }
  0x29   :  { %v341_v37 = vmul.f32 1.5625, %v1349_v23  ;;  %v342_v39 = vmul.f32 1.5625, %v1370_v32  ;;  %vm343_vm5 = vcmp.lt.f32.partialorder %v1247_v1, %v335_v25  ;;  %vm344_vm7 = vcmp.lt.f32.partialorder %v1256_v2, %v336_v27 }
  0x2a   :  { %v594_v38 = vsel %vm2388_vm2, %v583_v17, %v584_v29  ;;  %vm345_vm13 = vcmp.lt.f32.partialorder %v1261_v3, %v337_v28  ;;  %vm346_vm6 = vcmp.lt.f32.partialorder %v1271_v5, %v338_v33  ;;  %vm1562_vm11 = vmand %vm327_vm0, %vm343_vm5  ;;  %vm331_vm12 = vcmp.lt.f32.partialorder %v1331_v18, %v1516_v30  ;;  %v1720_v29 = vld [vmem:[%s2379_s2 + $0x2] ss:$8 sm:$0xf] }
  0x2b   :  { %v596_v36 = vsel %vm2391_vm10, %v592_v24, %v594_v38  ;;  %vm332_vm2 = vcmp.lt.f32.partialorder %v1336_v19, %v1530_v34  ;;  %vm347_vm1 = vcmp.lt.f32.partialorder %v1276_v6, %v339_v31  ;;  %vm1575_vm14 = vmand %vm328_vm3, %vm344_vm7  ;;  %vm333_vm0 = vcmp.lt.f32.partialorder %v1349_v23, %v325_v44  ;;  %2434 = vst [vmem:[#allocation3_spill] sm:$0xff] %v1720_v29  ;;  %v1736_v31 = vld [vmem:[%s2379_s2 + $0x2] ss:$8 sm:$0xf0] }
  0x2c   :  { %v598_v43 = vsel %vm2392_vm15, %v590_v22, %v596_v36  ;;  %vm348_vm5 = vcmp.lt.f32.partialorder %v1281_v7, %v340_v35  ;;  %vm1590_vm10 = vmand %vm329_vm4, %vm345_vm13  ;;  %v1600_v45 = vmul.f32 1.953125, %v1247_v1  ;;  %vm349_vm7 = vcmp.lt.f32.partialorder %v1290_v8, %v341_v37  ;;  %2436 = vst [vmem:[#allocation4_spill] sm:$0xff] %v1736_v31 }
  0x2d   :  { %v600_v46 = vadd.f32 %v598_v43, %v521_v11  ;;  %vm1611_vm13 = vmand %vm330_vm8, %vm346_vm6  ;;  %v1616_v47 = vmul.f32 1.953125, %v1256_v2  ;;  %v1619_v48 = vmul.f32 1.953125, %v1261_v3  ;;  %vm334_vm3 = vcmp.lt.f32.partialorder %v1370_v32, %v326_v60 }
  0x2e   :  { %vm350_vm4 = vcmp.lt.f32.partialorder %v1295_v9, %v342_v39  ;;  %vm1628_vm15 = vmand %vm331_vm12, %vm347_vm1  ;;  %v1633_v61 = vmul.f32 1.953125, %v1271_v5  ;;  %v1648_v30 = vmul.f32 1.953125, %v1276_v6  ;;  %v1651_v49 = vmul.f32 1.953125, %v1281_v7 }
  0x2f   :  { %601 = vst [vmem:[%s2379_s2] ss:$8 sm:$0xf] %v600_v46  ;;  %vm1641_vm6 = vmand %vm332_vm2, %vm348_vm5  ;;  %v1663_v54 = vmul.f32 1.953125, %v1290_v8  ;;  %v1666_v63 = vmul.f32 1.953125, %v1295_v9  ;;  %vm367_vm1 = vcmp.lt.f32.partialorder %v1300_v10, %v1600_v45  ;;  %v375_v4 = vmul.f32 1.953125, %v1300_v10 }
  0x30   :  { %602 = vst [vmem:[%s2379_s2] ss:$8 sm:$0xf0] %v600_v46  ;;  %vm1658_vm12 = vmand %vm333_vm0, %vm349_vm7  ;;  %v376_v15 = vmul.f32 1.953125, %v1310_v12  ;;  %v1683_v16 = vmul.f32 1.953125, %v1315_v13  ;;  %v1686_v22 = vmul.f32 1.953125, %v1320_v14  ;;  %vm2433_vm5 = vcmp.lt.s32.totalorder %v1426_v50, 256 }
  0x31   :  { %vm1674_vm8 = vmand %vm334_vm3, %vm350_vm4  ;;  %v1695_v60 = vmul.f32 1.953125, %v1331_v18  ;;  %v1698_v17 = vmul.f32 1.953125, %v1336_v19  ;;  %v1701_v24 = vmul.f32 1.953125, %v1349_v23  ;;  %v1704_v25 = vmul.f32 1.953125, %v1370_v32 }
  0x32   :  { %vm455_vm7 = vmand %vm1562_vm11, %vm2433_vm5  ;;  %vm383_vm5 = vcmp.lt.f32.partialorder %v1247_v1, %v375_v4  ;;  %vm384_vm3 = vcmp.lt.f32.partialorder %v1256_v2, %v376_v15  ;;  %vm2435_vm2 = vcmp.lt.s32.totalorder %v1430_v52, 256  ;;  %vm2437_vm0 = vcmp.lt.s32.totalorder %v1432_v53, 256 }
  0x33   :  { %vm456_vm11 = vmand %vm1575_vm14, %vm2393_vm9  ;;  %v1135_v27 = vsel %vm455_vm7, 1.0, %v1224_v0  ;;  %vm389_vm7 = vcmp.lt.f32.partialorder %v1290_v8, %v1701_v24  ;;  %vm2438_vm4 = vcmp.lt.s32.totalorder %v1442_v55, 256 }
  0x34   :  { %vm457_vm14 = vmand %vm1590_vm10, %vm2435_vm2  ;;  %v1136_v28 = vsel %vm456_vm11, 1.0, %v1224_v0  ;;  %v623_v33 = vrot.slane %v1135_v27, 4  ;;  %vm388_vm11 = vcmp.lt.f32.partialorder %v1281_v7, %v1698_v17 }
  0x35   :  { %vm458_vm10 = vmand %vm1611_vm13, %vm2437_vm0  ;;  %v1137_v35 = vsel %vm457_vm14, 1.0, %v1224_v0  ;;  %v629_v37 = vrot.slane %v1136_v28, 4  ;;  %vm374_vm13 = vcmp.lt.f32.partialorder %v1370_v32, %v1666_v63  ;;  %vm390_vm0 = vcmp.lt.f32.partialorder %v1295_v9, %v1704_v25 }
  0x36   :  { %vm459_vm9 = vmand %vm1628_vm15, %vm2438_vm4  ;;  %v1138_v39 = vsel %vm458_vm10, 1.0, %v1224_v0  ;;  %v624_v38 = vadd.f32 %v1135_v27, %v623_v33  ;;  %v635_v42 = vrot.slane %v1137_v35, 4  ;;  %vm2439_vm14 = vcmp.lt.s32.totalorder %v1444_v56, 256 }
  0x37   :  { %vm460_vm2 = vmand %vm1641_vm6, %vm2439_vm14  ;;  %v1139_v36 = vsel %vm459_vm9, 1.0, %v1224_v0  ;;  %v630_v41 = vadd.f32 %v1136_v28, %v629_v37  ;;  %v641_v43 = vrot.slane %v1138_v39, 4  ;;  %vm2440_vm15 = vcmp.lt.s32.totalorder %v1446_v57, 256 }
  0x38   :  { %vm461_vm4 = vmand %vm1658_vm12, %vm2440_vm15  ;;  %v1140_v46 = vsel %vm460_vm2, 1.0, %v1224_v0  ;;  %v625_v21 = vrot.slane %v624_v38, 2  ;;  %v636_v59 = vadd.f32 %v1137_v35, %v635_v42  ;;  %v647_v27 = vrot.slane %v1139_v36, 4 }
  0x39   :  { %vm2441_vm10 = vcmp.lt.s32.totalorder %v1448_v58, 256  ;;  %v1141_v11 = vsel %vm461_vm4, 1.0, %v1224_v0  ;;  %v631_v28 = vrot.slane %v630_v41, 2  ;;  %v642_v33 = vadd.f32 %v1138_v39, %v641_v43  ;;  %vm1781_vm6 = vmand %vm367_vm1, %vm383_vm5 }
  0x3a   :  { %vm462_vm9 = vmand %vm1674_vm8, %vm2441_vm10  ;;  %v653_v37 = vrot.slane %v1140_v46, 4  ;;  %v626_v26 = vadd.f32 %v625_v21, %v624_v38  ;;  %v637_v34 = vrot.slane %v636_v59, 2  ;;  %v648_v29 = vadd.f32 %v1139_v36, %v647_v27 }
  0x3b   :  { %v1142_v20 = vsel %vm462_vm9, 1.0, %v1224_v0  ;;  %v632_v44 = vadd.f32 %v631_v28, %v630_v41  ;;  %v643_v42 = vrot.slane %v642_v33, 2  ;;  %v659_v62 = vrot.slane %v1141_v11, 4 }
  0x3c   :  { %v654_v31 = vadd.f32 %v1140_v46, %v653_v37  ;;  %vm2444_vm12 = vcmp.lt.f32.partialorder %v1310_v12, %v1616_v47  ;;  %v627_v4 = vrot.slane %v626_v26, 1  ;;  %v638_v38 = vadd.f32 %v637_v34, %v636_v59 }
  0x3d   :  { %vm1790_vm8 = vmand %vm2444_vm12, %vm384_vm3  ;;  %v649_v45 = vrot.slane %v648_v29, 2  ;;  %v665_v36 = vrot.slane %v1142_v20, 4  ;;  %vm2447_vm1 = vcmp.lt.f32.partialorder %v1261_v3, %v1683_v16  ;;  %vm2448_vm5 = vcmp.lt.f32.partialorder %v1315_v13, %v1619_v48 }
  0x3e   :  { %vm1800_vm2 = vmand %vm2448_vm5, %vm2447_vm1  ;;  %v633_v15 = vrot.slane %v632_v44, 1  ;;  %v644_v47 = vadd.f32 %v643_v42, %v642_v33  ;;  %v655_v43 = vrot.slane %v654_v31, 2  ;;  %v660_v46 = vadd.f32 %v1141_v11, %v659_v62 }
  0x3f   :  { %vm2451_vm3 = vcmp.lt.f32.partialorder %v1271_v5, %v1686_v22  ;;  %vm2452_vm14 = vcmp.lt.f32.partialorder %v1320_v14, %v1633_v61  ;;  %v628_v16 = vadd.f32 %v627_v4, %v626_v26  ;;  %v639_v48 = vrot.slane %v638_v38, 1 }
  0x40   :  { %vm1810_vm15 = vmand %vm2452_vm14, %vm2451_vm3  ;;  %v650_v59 = vadd.f32 %v649_v45, %v648_v29  ;;  %v666_v27 = vadd.f32 %v1142_v20, %v665_v36  ;;  %vm2455_vm4 = vcmp.lt.f32.partialorder %v1276_v6, %v1695_v60  ;;  %vm2456_vm10 = vcmp.lt.f32.partialorder %v1331_v18, %v1648_v30 }
  0x41   :  { %vm1820_vm9 = vmand %vm2456_vm10, %vm2455_vm4  ;;  %v634_v22 = vadd.f32 %v633_v15, %v632_v44  ;;  %v645_v61 = vrot.slane %v644_v47, 1  ;;  %v656_v11 = vadd.f32 %v655_v43, %v654_v31  ;;  %v661_v28 = vrot.slane %v660_v46, 2 }
  0x42   :  { %vm2459_vm12 = vcmp.lt.f32.partialorder %v1336_v19, %v1651_v49  ;;  %v640_v60 = vadd.f32 %v639_v48, %v638_v38  ;;  %v651_v30 = vrot.slane %v650_v59, 1  ;;  %v667_v29 = vrot.slane %v666_v27, 2 }
  0x43   :  { %vm1830_vm1 = vmand %vm2459_vm12, %vm388_vm11  ;;  %vm2462_vm5 = vcmp.lt.f32.partialorder %v1349_v23, %v1663_v54  ;;  %v1846_v49 = vsub.f32 %v1300_v10, %v1247_v1  ;;  %v646_v17 = vadd.f32 %v645_v61, %v644_v47  ;;  %v657_v20 = vrot.slane %v656_v11, 1 }
  0x44   :  { %vm1840_vm3 = vmand %vm2462_vm5, %vm389_vm7  ;;  %v662_v33 = vadd.f32 %v661_v28, %v660_v46  ;;  %v679_v37 = vrot.slane %v634_v22, 7  ;;  %v652_v24 = vadd.f32 %v651_v30, %v650_v59  ;;  %v668_v34 = vadd.f32 %v667_v29, %v666_v27 }
  0x45   :  { %vm1854_vm11 = vmand %vm374_vm13, %vm390_vm0  ;;  %v680_v44 = vrot.slane %v640_v60, 6  ;;  %vm2467_vm7 = vcmp.lt.s32.totalorder %v1426_v50, 256  ;;  %v1864_v1 = vsub.f32 %v1310_v12, %v1256_v2  ;;  %v658_v25 = vadd.f32 %v657_v20, %v656_v11 }
  0x46   :  { %vm463_vm14 = vmand %vm1781_vm6, %vm2467_vm7  ;;  %v663_v42 = vrot.slane %v662_v33, 1  ;;  %v681_v4 = vrot.slane %v646_v17, 5  ;;  %vm2468_vm4 = vcmask 1040384   ;;  %vm2469_vm13 = vcmp.lt.s32.totalorder %v1428_v51, 256 }
  0x47   :  { %v686_v63 = vsel %vm2468_vm4, %v628_v16, %v679_v37  ;;  %vm464_vm0 = vmand %vm1790_vm8, %vm2469_vm13  ;;  %v669_v38 = vrot.slane %v668_v34, 1  ;;  %v682_v45 = vrot.slane %v652_v24, 4  ;;  %vm2470_vm10 = vcmp.lt.s32.totalorder %v1430_v52, 256 }
  0x48   :  { %vm465_vm6 = vmand %vm1800_vm2, %vm2470_vm10  ;;  %v1147_v2 = vsel %vm463_vm14, 1.0, %v1224_v0  ;;  %v1148_v12 = vsel %vm464_vm0, 1.0, %v1224_v0  ;;  %v664_v35 = vadd.f32 %v663_v42, %v662_v33  ;;  %v683_v36 = vrot.slane %v658_v25, 3  ;;  %v2482_v42 = vld [vmem:[#allocation2_spill] sm:$0xff] }
  0x49   :  { %vm2471_vm12 = vcmask 1042434   ;;  %vm2472_vm5 = vcmp.lt.s32.totalorder %v1432_v53, 256  ;;  %v1149_v39 = vsel %vm465_vm6, 1.0, %v1224_v0  ;;  %v670_v47 = vadd.f32 %v669_v38, %v668_v34 }
  0x4a   :  { %v687_v15 = vsel %vm2471_vm12, %v680_v44, %v681_v4  ;;  %vm466_vm8 = vmand %vm1810_vm15, %vm2472_vm5  ;;  %vm2473_vm7 = vcmask 1041408   ;;  %vm2474_vm2 = vcmp.lt.s32.totalorder %v1442_v55, 256  ;;  %v717_v46 = vrot.slane %v1147_v2, 4 }
  0x4b   :  { %v688_v43 = vsel %vm2473_vm7, %v686_v63, %v687_v15  ;;  %vm467_vm14 = vmand %vm1820_vm9, %vm2474_vm2  ;;  %v1150_v41 = vsel %vm466_vm8, 1.0, %v1224_v0  ;;  %v684_v16 = vrot.slane %v664_v35, 2  ;;  %vm2475_vm4 = vcmask 1044484  }
  0x4c   :  { %v689_v48 = vsel %vm2475_vm4, %v682_v45, %v683_v36  ;;  %vm2476_vm13 = vcmp.lt.s32.totalorder %v1444_v56, 256  ;;  %v1151_v21 = vsel %vm467_vm14, 1.0, %v1224_v0  ;;  %v723_v59 = vrot.slane %v1148_v12, 4  ;;  %vm2486_vm8 = vmmov %vm2473_vm7 }
  0x4d   :  { %vm468_vm15 = vmand %vm1830_vm1, %vm2476_vm13  ;;  %v685_v27 = vrot.slane %v670_v47, 1  ;;  %vm2477_vm0 = vcmp.lt.s32.totalorder %v1446_v57, 256  ;;  %v718_v22 = vadd.f32 %v1147_v2, %v717_v46  ;;  %v729_v61 = vrot.slane %v1149_v39, 4 }
  0x4e   :  { %vm469_vm9 = vmand %vm1840_vm3, %vm2477_vm0  ;;  %v1152_v62 = vsel %vm468_vm15, 1.0, %v1224_v0  ;;  %vm2478_vm10 = vcmp.lt.s32.totalorder %v1448_v58, 256  ;;  %v724_v28 = vadd.f32 %v1148_v12, %v723_v59  ;;  %v735_v26 = vrot.slane %v1150_v41, 4 }
  0x4f   :  { %vm470_vm6 = vmand %vm1854_vm11, %vm2478_vm10  ;;  %v1153_v11 = vsel %vm469_vm9, 1.0, %v1224_v0  ;;  %v741_v60 = vrot.slane %v1151_v21, 4  ;;  %vm2479_vm1 = vcmask 1046534   ;;  %v719_v31 = vrot.slane %v718_v22, 2 }
  0x50   :  { %v690_v30 = vsel %vm2479_vm1, %v684_v16, %v685_v27  ;;  %v1154_v29 = vsel %vm470_vm6, 1.0, %v1224_v0  ;;  %v730_v17 = vadd.f32 %v1149_v39, %v729_v61  ;;  %vm2480_vm3 = vcmask 1045508   ;;  %vm2487_vm7 = vmmov %vm2475_vm4 }
  0x51   :  { %v691_v20 = vsel %vm2480_vm3, %v689_v48, %v690_v30  ;;  %v725_v33 = vrot.slane %v724_v28, 2  ;;  %v736_v37 = vadd.f32 %v1150_v41, %v735_v26  ;;  %v742_v24 = vadd.f32 %v1151_v21, %v741_v60  ;;  %vm2493_vm0 = vmmov %vm2479_vm1 }
  0x52   :  { %vm2481_vm12 = vcmask 1043456   ;;  %v720_v54 = vadd.f32 %v719_v31, %v718_v22  ;;  %v731_v44 = vrot.slane %v730_v17, 2  ;;  %v747_v25 = vrot.slane %v1152_v62, 4  ;;  %vm2497_vm1 = vmmov %vm2480_vm3 }
  0x53   :  { %v692_v34 = vsel %vm2481_vm12, %v688_v43, %v691_v20  ;;  %v2483_v4 = vor.u32 %v1597_v40, %v2482_v42  ;;  %v726_v38 = vadd.f32 %v725_v33, %v724_v28  ;;  %v737_v45 = vrot.slane %v736_v37, 2  ;;  %vm2498_vm3 = vmmov %vm2481_vm12 }
  0x54   :  { %v743_v2 = vrot.slane %v742_v24, 2  ;;  %v721_v12 = vrot.slane %v720_v54, 1  ;;  %v732_v35 = vadd.f32 %v731_v44, %v730_v17  ;;  %v748_v36 = vadd.f32 %v1152_v62, %v747_v25 }
  0x55   :  { %v694_v63 = vadd.f32 %v692_v34, %v2483_v4  ;;  %v753_v15 = vrot.slane %v1153_v11, 4  ;;  %v727_v39 = vrot.slane %v726_v38, 1  ;;  %v738_v47 = vadd.f32 %v737_v45, %v736_v37 }
  0x56   :  { %v744_v43 = vadd.f32 %v743_v2, %v742_v24  ;;  %v759_v41 = vrot.slane %v1154_v29, 4  ;;  %v722_v40 = vadd.f32 %v721_v12, %v720_v54  ;;  %v733_v46 = vrot.slane %v732_v35, 1 }
  0x57   :  { %1145 = vst [vmem:[%s2379_s2 + $0x1] ss:$8 sm:$0xf] %v694_v63  ;;  %v749_v16 = vrot.slane %v748_v36, 2  ;;  %v754_v48 = vadd.f32 %v1153_v11, %v753_v15  ;;  %v728_v21 = vadd.f32 %v727_v39, %v726_v38  ;;  %v739_v59 = vrot.slane %v738_v47, 1 }
  0x58   :  { %1146 = vst [vmem:[%s2379_s2 + $0x1] ss:$8 sm:$0xf0] %v694_v63  ;;  %v745_v27 = vrot.slane %v744_v43, 1  ;;  %v760_v62 = vadd.f32 %v1154_v29, %v759_v41  ;;  %v734_v22 = vadd.f32 %v733_v46, %v732_v35  ;;  %v1920_v26 = vsub.f32 %v1315_v13, %v1261_v3 }
  0x59   :  { %v750_v61 = vadd.f32 %v749_v16, %v748_v36  ;;  %v755_v28 = vrot.slane %v754_v48, 2  ;;  %v740_v60 = vadd.f32 %v739_v59, %v738_v47  ;;  %v773_v17 = vrot.slane %v728_v21, 7  ;;  %v1986_v39 = vld [vmem:[%s2379_s2 + $0x3] ss:$8 sm:$0xf] }
  0x5a   :  { %v746_v30 = vadd.f32 %v745_v27, %v744_v43  ;;  %v761_v31 = vrot.slane %v760_v62, 2  ;;  %v774_v37 = vrot.slane %v734_v22, 6  ;;  %v1924_v11 = vsub.f32 %v1320_v14, %v1271_v5  ;;  %v2499_v59 = vld [vmem:[#allocation4_spill] sm:$0xff]  ;;  %v2500_v27 = vld [vmem:[#allocation3_spill] sm:$0xff] }
  0x5b   :  { %v751_v20 = vrot.slane %v750_v61, 1  ;;  %v756_v33 = vadd.f32 %v755_v28, %v754_v48  ;;  %v775_v29 = vrot.slane %v740_v60, 5  ;;  %vm2484_vm11 = vcmask 1040384  }
  0x5c   :  { %v762_v24 = vadd.f32 %v761_v31, %v760_v62  ;;  %v776_v34 = vrot.slane %v746_v30, 4  ;;  %v780_v54 = vsel %vm2484_vm11, %v722_v40, %v773_v17  ;;  %v1929_v3 = vsub.f32 %v1331_v18, %v1276_v6  ;;  %vm2502_vm12 = vmmov %vm2484_vm11 }
  0x5d   :  { %v752_v44 = vadd.f32 %v751_v20, %v750_v61  ;;  %v757_v25 = vrot.slane %v756_v33, 1  ;;  %v1933_v13 = vsub.f32 %v1336_v19, %v1281_v7  ;;  %vm2485_vm5 = vcmask 1042434  }
  0x5e   :  { %v763_v42 = vrot.slane %v762_v24, 1  ;;  %v781_v4 = vsel %vm2485_vm5, %v774_v37, %v775_v29  ;;  %v1938_v5 = vsub.f32 %v1349_v23, %v1290_v8  ;;  %v1942_v14 = vsub.f32 %v1370_v32, %v1295_v9  ;;  %vm2503_vm11 = vmmov %vm2485_vm5 }
  0x5f   :  { %v758_v63 = vadd.f32 %v757_v25, %v756_v33  ;;  %v777_v38 = vrot.slane %v752_v44, 3  ;;  %v782_v6 = vsel %vm2486_vm8, %v780_v54, %v781_v4  ;;  %v1947_v18 = vmul.f32 %v1846_v49, %v1846_v49 }
  0x60   :  { %v764_v7 = vadd.f32 %v763_v42, %v762_v24  ;;  %v1951_v19 = vmul.f32 %v1864_v1, %v1864_v1  ;;  %v1955_v8 = vmul.f32 %v1920_v26, %v1920_v26  ;;  %v1959_v9 = vmul.f32 %v1924_v11, %v1924_v11 }
  0x61   :  { %v778_v23 = vrot.slane %v758_v63, 2  ;;  %v783_v32 = vsel %vm2487_vm7, %v776_v34, %v777_v38  ;;  %v1964_v45 = vmul.f32 %v1929_v3, %v1929_v3  ;;  %v1968_v2 = vmul.f32 %v1933_v13, %v1933_v13 }
  0x62   :  { %v779_v12 = vrot.slane %v764_v7, 1  ;;  %v1972_v35 = vmul.f32 %v1938_v5, %v1938_v5  ;;  %v1976_v36 = vmul.f32 %v1942_v14, %v1942_v14  ;;  %vm2488_vm2 = vcmp.lt.s32.totalorder %v1426_v50, 256 }
  0x63   :  { %v1981_v15 = vsel %vm2488_vm2, 1.0, %v1224_v0  ;;  %vm2489_vm14 = vcmp.lt.s32.totalorder %v1428_v51, 256  ;;  %vm2490_vm4 = vcmp.lt.s32.totalorder %v1430_v52, 256  ;;  %vm2491_vm13 = vcmp.lt.s32.totalorder %v1432_v53, 256 }
  0x64   :  { %v1991_v47 = vsel %vm2489_vm14, 1.0, %v1224_v0  ;;  %v1996_v43 = vsel %vm2490_vm4, 1.0, %v1224_v0  ;;  %v2001_v50 = vsel %vm2491_vm13, 1.0, %v1224_v0  ;;  %vm2492_vm15 = vcmp.lt.s32.totalorder %v1442_v55, 256  ;;  %vm2504_vm14 = vmmov %vm2493_vm0 }
  0x65   :  { %v2006_v41 = vsel %vm2492_vm15, 1.0, %v1224_v0  ;;  %v784_v40 = vsel %vm2493_vm0, %v778_v23, %v779_v12  ;;  %vm2494_vm9 = vcmp.lt.s32.totalorder %v1444_v56, 256  ;;  %vm2495_vm10 = vcmp.lt.s32.totalorder %v1446_v57, 256  ;;  %v2027_v55 = vld [vmem:[%s2379_s2 + $0x3] ss:$8 sm:$0xf0]  ;;  %vm2507_vm13 = vmmov %vm2497_vm1 }
  0x66   :  { %v2012_v51 = vsel %vm2494_vm9, 1.0, %v1224_v0  ;;  %v2017_v52 = vsel %vm2495_vm10, 1.0, %v1224_v0  ;;  %vm2496_vm6 = vcmp.lt.s32.totalorder %v1448_v58, 256  ;;  %v785_v46 = vsel %vm2497_vm1, %v783_v32, %v784_v40  ;;  %vm2508_vm15 = vmmov %vm2498_vm3 }
  0x67   :  { %v2022_v53 = vsel %vm2496_vm6, 1.0, %v1224_v0  ;;  %v471_v56 = vmul.f32 %v1981_v15, %v1947_v18  ;;  %v472_v57 = vmul.f32 %v1991_v47, %v1951_v19  ;;  %v473_v16 = vmul.f32 %v1996_v43, %v1955_v8 }
  0x68   :  { %v786_v58 = vsel %vm2498_vm3, %v782_v6, %v785_v46  ;;  %v474_v0 = vmul.f32 %v2001_v50, %v1959_v9  ;;  %v475_v48 = vmul.f32 %v2006_v41, %v1964_v45  ;;  %v476_v21 = vmul.f32 %v2012_v51, %v1968_v2 }
  0x69   :  { %v2501_v62 = vor.u32 %v2499_v59, %v2500_v27  ;;  %v477_v61 = vmul.f32 %v2017_v52, %v1972_v35  ;;  %v478_v28 = vmul.f32 %v2022_v53, %v1976_v36  ;;  %v794_v60 = vor.u32 %v2027_v55, %v1986_v39 }
  0x6a   :  { %v795_v30 = vrot.slane %v471_v56, 4  ;;  %v801_v31 = vrot.slane %v472_v57, 4  ;;  %v807_v17 = vrot.slane %v473_v16, 4  ;;  %v813_v20 = vrot.slane %v474_v0, 4 }
  0x6b   :  { %v788_v22 = vadd.f32 %v786_v58, %v2501_v62  ;;  %v819_v33 = vrot.slane %v475_v48, 4  ;;  %v825_v37 = vrot.slane %v476_v21, 4  ;;  %v831_v24 = vrot.slane %v477_v61, 4 }
  0x6c   :  { %v796_v29 = vadd.f32 %v795_v30, %v471_v56  ;;  %v802_v34 = vadd.f32 %v801_v31, %v472_v57  ;;  %v808_v54 = vadd.f32 %v807_v17, %v473_v16  ;;  %v814_v44 = vadd.f32 %v813_v20, %v474_v0  ;;  %v2059_v56 = vpop.eup %1176 }
  0x6d   :  { %1157 = vst [vmem:[%s2379_s2 + $0x2] ss:$8 sm:$0xf] %v788_v22  ;;  %v820_v25 = vadd.f32 %v819_v33, %v475_v48  ;;  %v826_v42 = vadd.f32 %v825_v37, %v476_v21  ;;  %v832_v4 = vadd.f32 %v831_v24, %v477_v61  ;;  %v837_v63 = vrot.slane %v478_v28, 4 }
  0x6e   :  { %1158 = vst [vmem:[%s2379_s2 + $0x2] ss:$8 sm:$0xf0] %v788_v22  ;;  %v797_v38 = vrot.slane %v796_v29, 2  ;;  %v803_v6 = vrot.slane %v802_v34, 2  ;;  %v809_v7 = vrot.slane %v808_v54, 2  ;;  %vm101_vm2 = vweird.f32 %v2059_v56 }
  0x6f   :  { %v815_v23 = vrot.slane %v814_v44, 2  ;;  %v821_v32 = vrot.slane %v820_v25, 2  ;;  %v827_v12 = vrot.slane %v826_v42, 2  ;;  %v833_v40 = vrot.slane %v832_v4, 2 }
  0x70   :  { %v838_v46 = vadd.f32 %v837_v63, %v478_v28  ;;  %v798_v58 = vadd.f32 %v797_v38, %v796_v29  ;;  %v804_v59 = vadd.f32 %v803_v6, %v802_v34  ;;  %v810_v27 = vadd.f32 %v809_v7, %v808_v54 }
  0x71   :  { %v816_v62 = vadd.f32 %v815_v23, %v814_v44  ;;  %v822_v57 = vadd.f32 %v821_v32, %v820_v25  ;;  %v828_v16 = vadd.f32 %v827_v12, %v826_v42  ;;  %v834_v0 = vadd.f32 %v833_v40, %v832_v4 }
  0x72   :  { %v839_v48 = vrot.slane %v838_v46, 2  ;;  %v799_v21 = vrot.slane %v798_v58, 1  ;;  %v805_v22 = vrot.slane %v804_v59, 1  ;;  %v811_v61 = vrot.slane %v810_v27, 1 }
  0x73   :  { %v817_v30 = vrot.slane %v816_v62, 1  ;;  %v823_v31 = vrot.slane %v822_v57, 1  ;;  %v829_v17 = vrot.slane %v828_v16, 1  ;;  %v835_v20 = vrot.slane %v834_v0, 1 }
  0x74   :  { %v840_v33 = vadd.f32 %v839_v48, %v838_v46  ;;  %v800_v37 = vadd.f32 %v799_v21, %v798_v58  ;;  %v806_v28 = vadd.f32 %v805_v22, %v804_v59  ;;  %v812_v24 = vadd.f32 %v811_v61, %v810_v27  ;;  %v1208_v58 = vld [vmem:[%s2381_s1] sm:$0xff] }
  0x75   :  { %v818_v29 = vadd.f32 %v817_v30, %v816_v62  ;;  %v824_v34 = vadd.f32 %v823_v31, %v822_v57  ;;  %v830_v54 = vadd.f32 %v829_v17, %v828_v16  ;;  %v836_v44 = vadd.f32 %v835_v20, %v834_v0  ;;  %v1209_v0 = vld [vmem:[%s2381_s1 + $0x8] sm:$0xff] }
  0x76   :  { %v841_v63 = vrot.slane %v840_v33, 1  ;;  %v851_v25 = vrot.slane %v806_v28, 7  ;;  %v852_v42 = vrot.slane %v812_v24, 6  ;;  %v96_v38 = vmul.f32 %v2059_v56, %v1300_v10 }
  0x77   :  { %v853_v4 = vrot.slane %v818_v29, 5  ;;  %v854_v7 = vrot.slane %v824_v34, 4  ;;  %v855_v23 = vrot.slane %v830_v54, 3  ;;  %v856_v32 = vrot.slane %v836_v44, 2  ;;  %v1211_v54 = vld [vmem:[%s2381_s1 + $0x18] sm:$0xff] }
  0x78   :  { %v842_v6 = vadd.f32 %v841_v63, %v840_v33  ;;  %v858_v12 = vsel %vm2502_vm12, %v800_v37, %v851_v25  ;;  %v97_v46 = vsub.f32 1.0, %v96_v38  ;;  %vm100_vm5 = vweird.f32 %v1208_v58  ;;  %v1210_v33 = vld [vmem:[%s2381_s1 + $0x10] sm:$0xff]  ;;  %v1215_v29 = vld [vmem:[%s2381_s1 + $0x38] sm:$0xff] }
  0x79   :  { %v859_v40 = vsel %vm2503_vm11, %v852_v42, %v853_v4  ;;  %v861_v62 = vsel %vm2487_vm7, %v854_v7, %v855_v23  ;;  %v104_v57 = vand.u32 2147483647, %v1208_v58  ;;  %v106_v16 = vand.u32 2147483648, %v1208_v58  ;;  %vm2076_vm4 = vmor %vm100_vm5, %vm101_vm2 }
  0x7a   :  { %v857_v59 = vrot.slane %v842_v6, 1  ;;  %v860_v27 = vsel %vm2486_vm8, %v858_v12, %v859_v40  ;;  %v98_v10 = vmul.f32 %v2059_v56, %v97_v46  ;;  %1178 = vrcp.f32 %v1209_v0  ;;  %v1213_v6 = vld [vmem:[%s2381_s1 + $0x28] sm:$0xff] }
  0x7b   :  { %v119_v22 = vand.u32 2147483647, %v1209_v0  ;;  %v107_v31 = vor.u32 1.1754944e-38, %v106_v16  ;;  %v121_v17 = vand.u32 2147483648, %v1209_v0  ;;  %vm105_vm0 = vcmp.eq.f32.partialorder %v104_v57, 8.507059e+37  ;;  %v1214_v57 = vld [vmem:[%s2381_s1 + $0x30] sm:$0xff] }
  0x7c   :  { %v862_v48 = vsel %vm2504_vm14, %v856_v32, %v857_v59  ;;  %v99_v30 = vadd.f32 %v2059_v56, %v98_v10  ;;  %1180 = vrcp.f32 %v1210_v33  ;;  %v134_v24 = vand.u32 2147483647, %v1210_v33 }
  0x7d   :  { %v863_v61 = vsel %vm2507_vm13, %v861_v62, %v862_v48  ;;  %vm115_vm9 = vweird.f32 %v1209_v0  ;;  %vm2092_vm10 = vcmp.eq.f32.partialorder %v119_v22, 8.507059e+37  ;;  %v136_v34 = vand.u32 2147483648, %v1210_v33 }
  0x7e   :  { %v864_v20 = vsel %vm2508_vm15, %v860_v27, %v863_v61  ;;  %v103_v28 = vsel %vm2076_vm4, %v2059_v56, %v99_v30  ;;  %1182 = vrcp.f32 %v1211_v54  ;;  %v122_v55 = vor.u32 1.1754944e-38, %v121_v17 }
  0x7f   :  { %v866_v37 = vadd.f32 %v864_v20, %v794_v60  ;;  %v2102_v39 = vsel %vm105_vm0, %v107_v31, %v103_v28  ;;  %vm130_vm6 = vweird.f32 %v1210_v33  ;;  %v2107_v60 = vld [vmem:[%s2381_s1 + $0x20] sm:$0xff]  ;;  %vm145_vm1 = vweird.f32 %v1211_v54 }
  0x80   :  { %v1179_v44 = vpop.eup %1178  ;;  %1184 = vrcp.f32 %v2107_v60  ;;  %v149_v63 = vand.u32 2147483647, %v1211_v54  ;;  %v151_v25 = vand.u32 2147483648, %v1211_v54  ;;  %vm2113_vm3 = vcmp.eq.f32.partialorder %v134_v24, 8.507059e+37 }
  0x81   :  { %1161 = vst [vmem:[%s2379_s2 + $0x3] ss:$8 sm:$0xf] %v866_v37  ;;  %v111_v56 = vmul.f32 %v1209_v0, %v1179_v44  ;;  %vm160_vm12 = vweird.f32 %v2107_v60  ;;  %v164_v4 = vand.u32 2147483647, %v2107_v60  ;;  %v166_v38 = vand.u32 2147483648, %v2107_v60 }
  0x82   :  { %1162 = vst [vmem:[%s2379_s2 + $0x3] ss:$8 sm:$0xf0] %v866_v37  ;;  %1186 = vrcp.f32 %v1213_v6  ;;  %v1181_v7 = vpop.eup %1180  ;;  %vm116_vm11 = vweird.f32 %v1179_v44  ;;  %v137_v32 = vor.u32 1.1754944e-38, %v136_v34  ;;  %v179_v12 = vand.u32 2147483647, %v1213_v6 }
  0x83   :  { %v112_v23 = vsub.f32 1.0, %v111_v56  ;;  %v126_v40 = vmul.f32 %v1210_v33, %v1181_v7  ;;  %vm131_vm5 = vweird.f32 %v1181_v7  ;;  %v152_v46 = vor.u32 1.1754944e-38, %v151_v25  ;;  %vm2136_vm14 = vmor %vm115_vm9, %vm116_vm11 }
  0x84   :  { %vm175_vm8 = vweird.f32 %v1213_v6  ;;  %v1183_v58 = vpop.eup %1182  ;;  %vm2123_vm7 = vcmp.eq.f32.partialorder %v149_v63, 8.507059e+37  ;;  %vm2127_vm2 = vcmp.eq.f32.partialorder %v164_v4, 8.507059e+37  ;;  %v181_v10 = vand.u32 2147483648, %v1213_v6  ;;  %vm2149_vm9 = vmor %vm130_vm6, %vm131_vm5 }
  0x85   :  { %v113_v59 = vmul.f32 %v1179_v44, %v112_v23  ;;  %1188 = vrcp.f32 %v1214_v57  ;;  %v127_v21 = vsub.f32 1.0, %v126_v40  ;;  %v141_v22 = vmul.f32 %v1211_v54, %v1183_v58 }
  0x86   :  { %v1185_v16 = vpop.eup %1184  ;;  %vm146_vm4 = vweird.f32 %v1183_v58  ;;  %v167_v61 = vor.u32 1.1754944e-38, %v166_v38  ;;  %vm2141_vm15 = vcmp.eq.f32.partialorder %v179_v12, 8.507059e+37  ;;  %vm190_vm0 = vweird.f32 %v1214_v57 }
  0x87   :  { %v114_v30 = vadd.f32 %v1179_v44, %v113_v59  ;;  %v156_v31 = vmul.f32 %v2107_v60, %v1185_v16  ;;  %vm161_vm13 = vweird.f32 %v1185_v16  ;;  %v128_v37 = vmul.f32 %v1181_v7, %v127_v21 }
  0x88   :  { %v1187_v20 = vpop.eup %1186  ;;  %v142_v0 = vsub.f32 1.0, %v141_v22  ;;  %v194_v28 = vand.u32 2147483647, %v1214_v57  ;;  %v196_v24 = vand.u32 2147483648, %v1214_v57  ;;  %v182_v4 = vor.u32 1.1754944e-38, %v181_v10 }
  0x89   :  { %v118_v34 = vsel %vm2136_vm14, %v1179_v44, %v114_v30  ;;  %v157_v63 = vsub.f32 1.0, %v156_v31  ;;  %v171_v25 = vmul.f32 %v1213_v6, %v1187_v20  ;;  %v129_v23 = vadd.f32 %v1181_v7, %v128_v37  ;;  %vm2159_vm14 = vmor %vm145_vm1, %vm146_vm4 }
  0x8a   :  { %v2155_v38 = vsel %vm2092_vm10, %v122_v55, %v118_v34  ;;  %v143_v12 = vmul.f32 %v1183_v58, %v142_v0  ;;  %vm176_vm11 = vweird.f32 %v1187_v20  ;;  %vm2163_vm6 = vcmp.eq.f32.partialorder %v194_v28, 8.507059e+37  ;;  %vm2175_vm10 = vmor %vm160_vm12, %vm161_vm13 }
  0x8b   :  { %v1189_v40 = vpop.eup %1188  ;;  %v158_v33 = vmul.f32 %v1185_v16, %v157_v63  ;;  %v172_v59 = vsub.f32 1.0, %v171_v25  ;;  %1190 = vrcp.f32 %v1215_v29  ;;  %v133_v55 = vsel %vm2149_vm9, %v1181_v7, %v129_v23  ;;  %vm2187_vm5 = vmor %vm175_vm8, %vm176_vm11 }
  0x8c   :  { %v144_v10 = vadd.f32 %v1183_v58, %v143_v12  ;;  %v186_v21 = vmul.f32 %v1214_v57, %v1189_v40  ;;  %v197_v22 = vor.u32 1.1754944e-38, %v196_v24  ;;  %v2181_v30 = vsel %vm2113_vm3, %v137_v32, %v133_v55 }
  0x8d   :  { %v159_v31 = vadd.f32 %v1185_v16, %v158_v33  ;;  %v173_v37 = vmul.f32 %v1187_v20, %v172_v59  ;;  %vm191_vm1 = vweird.f32 %v1189_v40  ;;  %v209_v28 = vand.u32 2147483647, %v1215_v29 }
  0x8e   :  { %v148_v7 = vsel %vm2159_vm14, %v1183_v58, %v144_v10  ;;  %v187_v0 = vsub.f32 1.0, %v186_v21  ;;  %v211_v34 = vand.u32 2147483648, %v1215_v29  ;;  %vm205_vm3 = vweird.f32 %v1215_v29  ;;  %vm2210_vm8 = vmor %vm190_vm0, %vm191_vm1 }
  0x8f   :  { %v163_v42 = vsel %vm2175_vm10, %v1185_v16, %v159_v31  ;;  %v174_v32 = vadd.f32 %v1187_v20, %v173_v37  ;;  %v215_v24 = vand.u32 2147483647, %v1846_v49  ;;  %v2196_v56 = vsel %vm2123_vm7, %v152_v46, %v148_v7 }
  0x90   :  { %v2200_v6 = vsel %vm2127_vm2, %v167_v61, %v163_v42  ;;  %v188_v58 = vmul.f32 %v1189_v40, %v187_v0  ;;  %vm2202_vm12 = vcmp.eq.f32.partialorder %v209_v28, 8.507059e+37  ;;  %v216_v46 = vand.u32 2147483647, %v1864_v1 }
  0x91   :  { %v1191_v25 = vpop.eup %1190  ;;  %v178_v16 = vsel %vm2187_vm5, %v1187_v20, %v174_v32  ;;  %v217_v27 = vand.u32 2147483647, %v1920_v26  ;;  %v218_v62 = vand.u32 2147483647, %v1924_v11  ;;  %v212_v44 = vor.u32 1.1754944e-38, %v211_v34 }
  0x92   :  { %v2219_v61 = vsel %vm2141_vm15, %v182_v4, %v178_v16  ;;  %v189_v23 = vadd.f32 %v1189_v40, %v188_v58  ;;  %v201_v12 = vmul.f32 %v1215_v29, %v1191_v25  ;;  %v219_v20 = vand.u32 2147483647, %v1929_v3 }
  0x93   :  { %v220_v57 = vand.u32 2147483647, %v1933_v13  ;;  %v221_v33 = vand.u32 2147483647, %v1938_v5  ;;  %v223_v59 = vmul.f32 %v215_v24, %v2102_v39  ;;  %vm206_vm7 = vweird.f32 %v1191_v25 }
  0x94   :  { %v193_v1 = vsel %vm2210_vm8, %v1189_v40, %v189_v23  ;;  %v202_v26 = vsub.f32 1.0, %v201_v12  ;;  %v224_v11 = vmul.f32 %v216_v46, %v2155_v38  ;;  %v225_v4 = vmul.f32 %v217_v27, %v2181_v30  ;;  %vm2239_vm2 = vmor %vm205_vm3, %vm206_vm7 }
  0x95   :  { %v2230_v17 = vsel %vm2163_vm6, %v197_v22, %v193_v1  ;;  %v226_v3 = vmul.f32 %v218_v62, %v2196_v56  ;;  %v227_v13 = vmul.f32 %v219_v20, %v2200_v6  ;;  %v228_v55 = vmul.f32 %v220_v57, %v2219_v61 }
  0x96   :  { %v203_v5 = vmul.f32 %v1191_v25, %v202_v26  ;;  %v229_v10 = vmul.f32 %v221_v33, %v2230_v17  ;;  %v479_v40 = vmul.f32 %v1981_v15, %v223_v59  ;;  %v480_v48 = vmul.f32 %v1991_v47, %v224_v11 }
  0x97   :  { %v481_v21 = vmul.f32 %v1996_v43, %v225_v4  ;;  %v482_v22 = vmul.f32 %v2001_v50, %v226_v3  ;;  %v483_v31 = vmul.f32 %v2006_v41, %v227_v13  ;;  %v222_v7 = vand.u32 2147483647, %v1942_v14 }
  0x98   :  { %v204_v37 = vadd.f32 %v1191_v25, %v203_v5  ;;  %v484_v60 = vmul.f32 %v2012_v51, %v228_v55  ;;  %v485_v0 = vmul.f32 %v2017_v52, %v229_v10  ;;  %v873_v29 = vrot.slane %v479_v40, 4 }
  0x99   :  { %v879_v28 = vrot.slane %v480_v48, 4  ;;  %v885_v34 = vrot.slane %v481_v21, 4  ;;  %v891_v42 = vrot.slane %v482_v22, 4  ;;  %v897_v24 = vrot.slane %v483_v31, 4 }
  0x9a   :  { %v208_v32 = vsel %vm2239_vm2, %v1191_v25, %v204_v37  ;;  %v903_v58 = vrot.slane %v484_v60, 4  ;;  %v909_v16 = vrot.slane %v485_v0, 4  ;;  %v874_v46 = vadd.f32 %v873_v29, %v479_v40 }
  0x9b   :  { %v2254_v49 = vsel %vm2202_vm12, %v212_v44, %v208_v32  ;;  %v880_v14 = vadd.f32 %v879_v28, %v480_v48  ;;  %v886_v27 = vadd.f32 %v885_v34, %v481_v21  ;;  %v892_v23 = vadd.f32 %v891_v42, %v482_v22  ;;  %v1164_v32 = vld [vmem:[%s2379_s2 + $0x4] ss:$8 sm:$0xf0] }
  0x9c   :  { %v230_v62 = vmul.f32 %v222_v7, %v2254_v49  ;;  %v898_v12 = vadd.f32 %v897_v24, %v483_v31  ;;  %v904_v20 = vadd.f32 %v903_v58, %v484_v60  ;;  %v875_v57 = vrot.slane %v874_v46, 2 }
  0x9d   :  { %v881_v33 = vrot.slane %v880_v14, 2  ;;  %v887_v59 = vrot.slane %v886_v27, 2  ;;  %v910_v1 = vadd.f32 %v909_v16, %v485_v0  ;;  %v893_v26 = vrot.slane %v892_v23, 2  ;;  %v1163_v0 = vld [vmem:[%s2379_s2 + $0x4] ss:$8 sm:$0xf] }
  0x9e   :  { %v486_v25 = vmul.f32 %v2022_v53, %v230_v62  ;;  %v899_v11 = vrot.slane %v898_v12, 2  ;;  %v905_v4 = vrot.slane %v904_v20, 2  ;;  %v876_v63 = vadd.f32 %v875_v57, %v874_v46 }
  0x9f   :  { %v882_v44 = vadd.f32 %v881_v33, %v880_v14  ;;  %v888_v3 = vadd.f32 %v887_v59, %v886_v27  ;;  %v911_v13 = vrot.slane %v910_v1, 2  ;;  %v894_v5 = vadd.f32 %v893_v26, %v892_v23 }
  0xa0   :  { %v900_v55 = vadd.f32 %v899_v11, %v898_v12  ;;  %v906_v10 = vadd.f32 %v905_v4, %v904_v20  ;;  %v915_v40 = vrot.slane %v486_v25, 4  ;;  %v877_v54 = vrot.slane %v876_v63, 1 }
  0xa1   :  { %v883_v48 = vrot.slane %v882_v44, 1  ;;  %v889_v21 = vrot.slane %v888_v3, 1  ;;  %v912_v22 = vadd.f32 %v911_v13, %v910_v1  ;;  %v895_v31 = vrot.slane %v894_v5, 1 }
  0xa2   :  { %v901_v37 = vrot.slane %v900_v55, 1  ;;  %v907_v7 = vrot.slane %v906_v10, 1  ;;  %v916_v60 = vadd.f32 %v915_v40, %v486_v25  ;;  %v878_v29 = vadd.f32 %v877_v54, %v876_v63 }
  0xa3   :  { %v884_v28 = vadd.f32 %v883_v48, %v882_v44  ;;  %v890_v34 = vadd.f32 %v889_v21, %v888_v3  ;;  %v913_v42 = vrot.slane %v912_v22, 1  ;;  %v896_v24 = vadd.f32 %v895_v31, %v894_v5 }
  0xa4   :  { %v902_v58 = vadd.f32 %v901_v37, %v900_v55  ;;  %v908_v16 = vadd.f32 %v907_v7, %v906_v10  ;;  %v917_v46 = vrot.slane %v916_v60, 2  ;;  %v231_v23 = vmul.f32 %v2102_v39, %v1947_v18 }
  0xa5   :  { %v914_v14 = vadd.f32 %v913_v42, %v912_v22  ;;  %v929_v27 = vrot.slane %v884_v28, 7  ;;  %v930_v62 = vrot.slane %v890_v34, 6  ;;  %v931_v20 = vrot.slane %v896_v24, 5 }
  0xa6   :  { %v918_v12 = vadd.f32 %v917_v46, %v916_v60  ;;  %v932_v57 = vrot.slane %v902_v58, 4  ;;  %v933_v33 = vrot.slane %v908_v16, 3  ;;  %v872_v59 = vor.u32 %v1164_v32, %v1163_v0 }
  0xa7   :  { %v934_v1 = vrot.slane %v914_v14, 2  ;;  %v232_v25 = vmul.f32 %v2155_v38, %v1951_v19  ;;  %v233_v26 = vmul.f32 %v2181_v30, %v1955_v8  ;;  %vm2537_vm4 = vcmask 1040384  }
  0xa8   :  { %v919_v11 = vrot.slane %v918_v12, 1  ;;  %v936_v4 = vsel %vm2537_vm4, %v878_v29, %v929_v27  ;;  %vm2538_vm13 = vcmask 1042434   ;;  %v234_v18 = vmul.f32 %v2196_v56, %v1959_v9  ;;  %vm2544_vm6 = vmmov %vm2537_vm4 }
  0xa9   :  { %v937_v63 = vsel %vm2538_vm13, %v930_v62, %v931_v20  ;;  %vm2539_vm15 = vcmask 1044484   ;;  %v235_v3 = vmul.f32 %v2200_v6, %v1964_v45  ;;  %v236_v13 = vmul.f32 %v2219_v61, %v1968_v2  ;;  %vm2545_vm10 = vmmov %vm2538_vm13 }
  0xaa   :  { %v939_v44 = vsel %vm2539_vm15, %v932_v57, %v933_v33  ;;  %v237_v19 = vmul.f32 %v2230_v17, %v1972_v35  ;;  %v920_v8 = vadd.f32 %v919_v11, %v918_v12  ;;  %v238_v5 = vmul.f32 %v2254_v49, %v1976_v36  ;;  %vm2547_vm5 = vmmov %vm2539_vm15 }
  0xab   :  { %v487_v55 = vmul.f32 %v1981_v15, %v231_v23  ;;  %v488_v10 = vmul.f32 %v1991_v47, %v232_v25  ;;  %v489_v9 = vmul.f32 %v1996_v43, %v233_v26  ;;  %v490_v40 = vmul.f32 %v2001_v50, %v234_v18  ;;  %vm2551_vm7 = vmmov %vm2537_vm4 }
  0xac   :  { %v491_v45 = vmul.f32 %v2006_v41, %v235_v3  ;;  %v492_v54 = vmul.f32 %v2012_v51, %v236_v13  ;;  %v935_v2 = vrot.slane %v920_v8, 1  ;;  %vm2540_vm0 = vcmask 1041408   ;;  %vm2552_vm2 = vmmov %vm2545_vm10 }
  0xad   :  { %v938_v48 = vsel %vm2540_vm0, %v936_v4, %v937_v63  ;;  %v493_v35 = vmul.f32 %v2017_v52, %v237_v19  ;;  %v494_v21 = vmul.f32 %v2022_v53, %v238_v5  ;;  %v951_v36 = vrot.slane %v487_v55, 4  ;;  %vm2546_vm1 = vmmov %vm2540_vm0 }
  0xae   :  { %v957_v22 = vrot.slane %v488_v10, 4  ;;  %v963_v31 = vrot.slane %v489_v9, 4  ;;  %v969_v37 = vrot.slane %v490_v40, 4  ;;  %vm2541_vm9 = vcmask 1046534   ;;  %vm2553_vm4 = vmmov %vm2547_vm5 }
  0xaf   :  { %v940_v7 = vsel %vm2541_vm9, %v934_v1, %v935_v2  ;;  %v975_v60 = vrot.slane %v491_v45, 4  ;;  %v981_v0 = vrot.slane %v492_v54, 4  ;;  %v987_v29 = vrot.slane %v493_v35, 4  ;;  %vm2548_vm3 = vmmov %vm2541_vm9 }
  0xb0   :  { %vm2542_vm11 = vcmask 1045508   ;;  %v952_v34 = vadd.f32 %v951_v36, %v487_v55  ;;  %v958_v42 = vadd.f32 %v957_v22, %v488_v10  ;;  %v964_v32 = vadd.f32 %v963_v31, %v489_v9  ;;  %vm2554_vm13 = vmmov %vm2540_vm0 }
  0xb1   :  { %v941_v28 = vsel %vm2542_vm11, %v939_v44, %v940_v7  ;;  %vm2543_vm14 = vcmask 1043456   ;;  %v970_v58 = vadd.f32 %v969_v37, %v490_v40  ;;  %v976_v16 = vadd.f32 %v975_v60, %v491_v45  ;;  %vm2549_vm12 = vmmov %vm2542_vm11 }
  0xb2   :  { %v942_v24 = vsel %vm2543_vm14, %v938_v48, %v941_v28  ;;  %v982_v46 = vadd.f32 %v981_v0, %v492_v54  ;;  %v953_v27 = vrot.slane %v952_v34, 2  ;;  %v959_v62 = vrot.slane %v958_v42, 2  ;;  %vm2550_vm8 = vmmov %vm2543_vm14 }
  0xb3   :  { %v944_v14 = vadd.f32 %v942_v24, %v872_v59  ;;  %v965_v23 = vrot.slane %v964_v32, 2  ;;  %v971_v12 = vrot.slane %v970_v58, 2  ;;  %v977_v20 = vrot.slane %v976_v16, 2  ;;  %vm2555_vm15 = vmmov %vm2548_vm3 }
  0xb4   :  { %v983_v57 = vrot.slane %v982_v46, 2  ;;  %v988_v33 = vadd.f32 %v987_v29, %v493_v35  ;;  %v954_v1 = vadd.f32 %v953_v27, %v952_v34  ;;  %v960_v25 = vadd.f32 %v959_v62, %v958_v42  ;;  %vm2556_vm0 = vmmov %vm2542_vm11 }
  0xb5   :  { %1165 = vst [vmem:[%s2379_s2 + $0x4] ss:$8 sm:$0xf] %v944_v14  ;;  %v966_v26 = vadd.f32 %v965_v23, %v964_v32  ;;  %v993_v11 = vrot.slane %v494_v21, 4  ;;  %v972_v59 = vadd.f32 %v971_v12, %v970_v58  ;;  %v978_v4 = vadd.f32 %v977_v20, %v976_v16  ;;  %v1217_v32 = vld [vmem:[%s2380_s0 + $0x8] sm:$0xff]  ;;  %v1219_v23 = vld [vmem:[%s2380_s0 + $0x18] sm:$0xff]  ;;  %vm2557_vm9 = vmmov %vm2550_vm8 }
  0xb6   :  { %1166 = vst [vmem:[%s2379_s2 + $0x4] ss:$8 sm:$0xf0] %v944_v14  ;;  %v984_v63 = vadd.f32 %v983_v57, %v982_v46  ;;  %v989_v18 = vrot.slane %v988_v33, 2  ;;  %v955_v44 = vrot.slane %v954_v1, 1  ;;  %v961_v3 = vrot.slane %v960_v25, 1 }
  0xb7   :  { %v967_v13 = vrot.slane %v966_v26, 1  ;;  %v994_v19 = vadd.f32 %v993_v11, %v494_v21  ;;  %v973_v8 = vrot.slane %v972_v59, 1  ;;  %v979_v5 = vrot.slane %v978_v4, 1  ;;  %v1216_v21 = vld [vmem:[%s2380_s0] sm:$0xff] }
  0xb8   :  { %v985_v55 = vrot.slane %v984_v63, 1  ;;  %v990_v10 = vadd.f32 %v989_v18, %v988_v33  ;;  %v956_v9 = vadd.f32 %v955_v44, %v954_v1  ;;  %v962_v40 = vadd.f32 %v961_v3, %v960_v25  ;;  %v1167_v58 = vld [vmem:[%s2379_s2 + $0x5] ss:$8 sm:$0xf] }
  0xb9   :  { %v968_v45 = vadd.f32 %v967_v13, %v966_v26  ;;  %v995_v54 = vrot.slane %v994_v19, 2  ;;  %v974_v2 = vadd.f32 %v973_v8, %v972_v59  ;;  %v980_v48 = vadd.f32 %v979_v5, %v978_v4  ;;  %v1168_v14 = vld [vmem:[%s2379_s2 + $0x5] ss:$8 sm:$0xf0] }
  0xba   :  { %v986_v35 = vadd.f32 %v985_v55, %v984_v63  ;;  %v991_v36 = vrot.slane %v990_v10, 1  ;;  %v1007_v31 = vrot.slane %v962_v40, 7  ;;  %v239_v29 = vmul.f32 %v1216_v21, %v2102_v39  ;;  %v1218_v39 = vld [vmem:[%s2380_s0 + $0x10] sm:$0xff]  ;;  %v1220_v20 = vld [vmem:[%s2380_s0 + $0x20] sm:$0xff]  ;;  %v1221_v1 = vld [vmem:[%s2380_s0 + $0x28] sm:$0xff] }
  0xbb   :  { %v996_v22 = vadd.f32 %v995_v54, %v994_v19  ;;  %v1008_v37 = vrot.slane %v968_v45, 6  ;;  %v1009_v60 = vrot.slane %v974_v2, 5  ;;  %v1010_v0 = vrot.slane %v980_v48, 4  ;;  %v1223_v59 = vld [vmem:[%s2380_s0 + $0x38] sm:$0xff] }
  0xbc   :  { %v992_v7 = vadd.f32 %v991_v36, %v990_v10  ;;  %v1011_v34 = vrot.slane %v986_v35, 3  ;;  %v1014_v42 = vsel %vm2544_vm6, %v956_v9, %v1007_v31  ;;  %v240_v24 = vmul.f32 %v1217_v32, %v2155_v38 }
  0xbd   :  { %v997_v28 = vrot.slane %v996_v22, 1  ;;  %v1015_v16 = vsel %vm2545_vm10, %v1008_v37, %v1009_v60  ;;  %v241_v46 = vmul.f32 %v1218_v39, %v2181_v30  ;;  %v242_v12 = vmul.f32 %v1219_v23, %v2196_v56  ;;  %v1222_v56 = vld [vmem:[%s2380_s0 + $0x30] sm:$0xff] }
  0xbe   :  { %v1012_v62 = vrot.slane %v992_v7, 2  ;;  %v1016_v38 = vsel %vm2546_vm1, %v1014_v42, %v1015_v16  ;;  %v243_v30 = vmul.f32 %v1220_v20, %v2200_v6  ;;  %1192 = vlog2.f32 %v239_v29 }
  0xbf   :  { %v998_v27 = vadd.f32 %v997_v28, %v996_v22  ;;  %v1017_v33 = vsel %vm2547_vm5, %v1010_v0, %v1011_v34  ;;  %v244_v25 = vmul.f32 %v1221_v1, %v2219_v61  ;;  %1194 = vlog2.f32 %v240_v24 }
  0xc0   :  { %v950_v26 = vor.u32 %v1168_v14, %v1167_v58  ;;  %v245_v11 = vmul.f32 %v1222_v56, %v2230_v17  ;;  %1196 = vlog2.f32 %v241_v46  ;;  %v246_v4 = vmul.f32 %v1223_v59, %v2254_v49 }
  0xc1   :  { %v1013_v57 = vrot.slane %v998_v27, 1  ;;  %1198 = vlog2.f32 %v242_v12 }
  0xc2   :  { %1200 = vlog2.f32 %v243_v30 }
  0xc3   :  { %v1018_v6 = vsel %vm2548_vm3, %v1012_v62, %v1013_v57  ;;  %1202 = vlog2.f32 %v244_v25 }
  0xc4   :  { %v1019_v61 = vsel %vm2549_vm12, %v1017_v33, %v1018_v6  ;;  %v1193_v18 = vpop.eup %1192  ;;  %1204 = vlog2.f32 %v245_v11 }
  0xc5   :  { %v1020_v63 = vsel %vm2550_vm8, %v1016_v38, %v1019_v61  ;;  %v1195_v17 = vpop.eup %1194  ;;  %v248_v3 = vmul.f32 0.6931472, %v1193_v18  ;;  %1206 = vlog2.f32 %v246_v4 }
  0xc6   :  { %v1022_v44 = vadd.f32 %v1020_v63, %v950_v26  ;;  %v1197_v13 = vpop.eup %1196  ;;  %v250_v19 = vmul.f32 0.6931472, %v1195_v17 }
  0xc7   :  { %v1199_v49 = vpop.eup %1198  ;;  %v252_v8 = vmul.f32 0.6931472, %v1197_v13  ;;  %v263_v10 = vand.u32 2147483647, %v248_v3 }
  0xc8   :  { %1169 = vst [vmem:[%s2379_s2 + $0x5] ss:$8 sm:$0xf] %v1022_v44  ;;  %v1201_v5 = vpop.eup %1200  ;;  %v254_v55 = vmul.f32 0.6931472, %v1199_v49 }
  0xc9   :  { %1170 = vst [vmem:[%s2379_s2 + $0x5] ss:$8 sm:$0xf0] %v1022_v44  ;;  %v264_v9 = vand.u32 2147483647, %v250_v19  ;;  %v1203_v40 = vpop.eup %1202 }
  0xca   :  { %v256_v45 = vmul.f32 0.6931472, %v1201_v5  ;;  %v265_v54 = vand.u32 2147483647, %v252_v8  ;;  %v1205_v2 = vpop.eup %1204  ;;  %v258_v48 = vmul.f32 0.6931472, %v1203_v40 }
  0xcb   :  { %v266_v35 = vand.u32 2147483647, %v254_v55  ;;  %v271_v36 = vmul.f32 0.4342945, %v263_v10  ;;  %v1207_v22 = vpop.eup %1206  ;;  %v260_v31 = vmul.f32 0.6931472, %v1205_v2 }
  0xcc   :  { %v267_v37 = vand.u32 2147483647, %v256_v45  ;;  %v272_v7 = vmul.f32 0.4342945, %v264_v9  ;;  %v262_v60 = vmul.f32 0.6931472, %v1207_v22 }
  0xcd   :  { %v268_v0 = vand.u32 2147483647, %v258_v48  ;;  %v273_v21 = vmul.f32 0.4342945, %v265_v54  ;;  %v495_v29 = vmul.f32 %v1981_v15, %v271_v36  ;;  %v269_v28 = vand.u32 2147483647, %v260_v31 }
  0xce   :  { %v274_v34 = vmul.f32 0.4342945, %v266_v35  ;;  %v275_v42 = vmul.f32 0.4342945, %v267_v37  ;;  %v496_v32 = vmul.f32 %v1991_v47, %v272_v7  ;;  %v270_v24 = vand.u32 2147483647, %v262_v60 }
  0xcf   :  { %v276_v58 = vmul.f32 0.4342945, %v268_v0  ;;  %v497_v16 = vmul.f32 %v1996_v43, %v273_v21  ;;  %v1029_v39 = vrot.slane %v495_v29, 4  ;;  %v277_v46 = vmul.f32 0.4342945, %v269_v28 }
  0xd0   :  { %v498_v14 = vmul.f32 %v2001_v50, %v274_v34  ;;  %v499_v27 = vmul.f32 %v2006_v41, %v275_v42  ;;  %v1035_v62 = vrot.slane %v496_v32, 4  ;;  %v278_v38 = vmul.f32 0.4342945, %v270_v24  ;;  %v1171_v21 = vld [vmem:[%s2379_s2 + $0x6] ss:$8 sm:$0xf] }
  0xd1   :  { %v500_v23 = vmul.f32 %v2012_v51, %v276_v58  ;;  %v1030_v15 = vadd.f32 %v1029_v39, %v495_v29  ;;  %v1041_v12 = vrot.slane %v497_v16, 4  ;;  %v501_v20 = vmul.f32 %v2017_v52, %v277_v46  ;;  %v1172_v42 = vld [vmem:[%s2379_s2 + $0x6] ss:$8 sm:$0xf0] }
  0xd2   :  { %v1036_v30 = vadd.f32 %v1035_v62, %v496_v32  ;;  %v1047_v47 = vrot.slane %v498_v14, 4  ;;  %v1053_v57 = vrot.slane %v499_v27, 4  ;;  %v502_v33 = vmul.f32 %v2022_v53, %v278_v38 }
  0xd3   :  { %v1031_v43 = vrot.slane %v1030_v15, 2  ;;  %v1042_v1 = vadd.f32 %v1041_v12, %v497_v16  ;;  %v1059_v25 = vrot.slane %v500_v23, 4  ;;  %v1065_v41 = vrot.slane %v501_v20, 4 }
  0xd4   :  { %v1037_v26 = vrot.slane %v1036_v30, 2  ;;  %v1048_v50 = vadd.f32 %v1047_v47, %v498_v14  ;;  %v1054_v56 = vadd.f32 %v1053_v57, %v499_v27  ;;  %v1071_v51 = vrot.slane %v502_v33, 4 }
  0xd5   :  { %v1032_v11 = vadd.f32 %v1031_v43, %v1030_v15  ;;  %v1043_v6 = vrot.slane %v1042_v1, 2  ;;  %v1060_v59 = vadd.f32 %v1059_v25, %v500_v23  ;;  %v1066_v52 = vadd.f32 %v1065_v41, %v501_v20 }
  0xd6   :  { %v1038_v4 = vadd.f32 %v1037_v26, %v1036_v30  ;;  %v1049_v61 = vrot.slane %v1048_v50, 2  ;;  %v1055_v63 = vrot.slane %v1054_v56, 2  ;;  %v1072_v3 = vadd.f32 %v1071_v51, %v502_v33 }
  0xd7   :  { %v1033_v18 = vrot.slane %v1032_v11, 1  ;;  %v1044_v44 = vadd.f32 %v1043_v6, %v1042_v1  ;;  %v1061_v17 = vrot.slane %v1060_v59, 2  ;;  %v1067_v49 = vrot.slane %v1066_v52, 2 }
  0xd8   :  { %v1039_v53 = vrot.slane %v1038_v4, 1  ;;  %v1050_v13 = vadd.f32 %v1049_v61, %v1048_v50  ;;  %v1056_v19 = vadd.f32 %v1055_v63, %v1054_v56  ;;  %v1073_v55 = vrot.slane %v1072_v3, 2 }
  0xd9   :  { %v1045_v8 = vrot.slane %v1044_v44, 1  ;;  %v1062_v5 = vadd.f32 %v1061_v17, %v1060_v59  ;;  %v1068_v45 = vadd.f32 %v1067_v49, %v1066_v52  ;;  %v1034_v54 = vadd.f32 %v1033_v18, %v1032_v11 }
  0xda   :  { %v1040_v10 = vadd.f32 %v1039_v53, %v1038_v4  ;;  %v1051_v9 = vrot.slane %v1050_v13, 1  ;;  %v1057_v40 = vrot.slane %v1056_v19, 1  ;;  %v1074_v35 = vadd.f32 %v1073_v55, %v1072_v3 }
  0xdb   :  { %v1046_v2 = vadd.f32 %v1045_v8, %v1044_v44  ;;  %v1063_v48 = vrot.slane %v1062_v5, 1  ;;  %v1069_v31 = vrot.slane %v1068_v45, 1  ;;  %v1028_v27 = vor.u32 %v1172_v42, %v1171_v21 }
  0xdc   :  { %v1052_v36 = vadd.f32 %v1051_v9, %v1050_v13  ;;  %v1058_v22 = vadd.f32 %v1057_v40, %v1056_v19  ;;  %v1085_v37 = vrot.slane %v1040_v10, 7  ;;  %v1075_v60 = vrot.slane %v1074_v35, 1 }
  0xdd   :  { %v1064_v7 = vadd.f32 %v1063_v48, %v1062_v5  ;;  %v1086_v0 = vrot.slane %v1046_v2, 6  ;;  %v1070_v29 = vadd.f32 %v1069_v31, %v1068_v45 }
  0xde   :  { %v1087_v28 = vrot.slane %v1052_v36, 5  ;;  %v1088_v34 = vrot.slane %v1058_v22, 4  ;;  %v1076_v32 = vadd.f32 %v1075_v60, %v1074_v35  ;;  %v1092_v58 = vsel %vm2551_vm7, %v1034_v54, %v1085_v37 }
  0xdf   :  { %v1089_v24 = vrot.slane %v1064_v7, 3  ;;  %v1090_v16 = vrot.slane %v1070_v29, 2 }
  0xe0   :  { %v1093_v39 = vsel %vm2552_vm2, %v1086_v0, %v1087_v28  ;;  %v1091_v46 = vrot.slane %v1076_v32, 1 }
  0xe1   :  { %v1095_v14 = vsel %vm2553_vm4, %v1088_v34, %v1089_v24  ;;  %v1094_v62 = vsel %vm2554_vm13, %v1092_v58, %v1093_v39 }
  0xe2   :  { %v1096_v38 = vsel %vm2555_vm15, %v1090_v16, %v1091_v46 }
  0xe3   :  { %v1097_v23 = vsel %vm2556_vm0, %v1095_v14, %v1096_v38 }
  0xe4   :  { %v1098_v15 = vsel %vm2557_vm9, %v1094_v62, %v1097_v23 }
  0xe5   :  { %v1100_v12 = vadd.f32 %v1098_v15, %v1028_v27 }
  0xe7   :  { %1173 = vst [vmem:[%s2379_s2 + $0x6] ss:$8 sm:$0xf] %v1100_v12 }
  0xe8   :  { %1174 = vst [vmem:[%s2379_s2 + $0x6] ss:$8 sm:$0xf0] %v1100_v12 }

</bundles_post_ra>
